<compile_context>
chip_gen: v7x
topology: tpu7x:2x2x1
jax: 0.10.0
libtpu: 0.0.40
codegen_flags: <defaults>
</compile_context>

<pallas_src>
import math
import functools

import jax
import jax.numpy as jnp
from jax import lax
from jax.experimental import pallas as pl
from jax.experimental.pallas import tpu as pltpu


def _mm_nt_bf16(x_f32, w_bf16):
    """x: (M, K) f32, w: (N, K) bf16 [PyTorch Linear (out,in) layout] -> (M, N) f32.
    bf16 MXU operands, f32 accumulation, no in-kernel transpose."""
    return lax.dot_general(x_f32.astype(jnp.bfloat16), w_bf16,
                           (((1,), (1,)), ((), ())),
                           preferred_element_type=jnp.float32)


def _layernorm_padded(x, w, b, d_real, eps=1e-5):
    """LayerNorm over the real `d_real` features of a lane-padded (M, Dp) tensor.
    Requires the padded lanes of `x` to be exactly zero (guaranteed by zero-padded
    weights/biases upstream), so full-width sums equal real-feature sums."""
    sum_x = jnp.sum(x, axis=-1, keepdims=True)
    sum_x2 = jnp.sum(x * x, axis=-1, keepdims=True)
    mu = sum_x / d_real
    var = sum_x2 / d_real - mu * mu
    # w/b are zero in the padded lanes -> padded output lanes stay exactly zero.
    return (x - mu) * lax.rsqrt(var + eps) * w + b


def transformer_block_kernel(
    # activations (one batch tile per grid step), lane-padded to d_pad
    q_ref, k_ref, v_ref,
    # attention params (full-width, PyTorch (out,in) layout, bf16 weights / f32 biases)
    wq_ref, bq_ref, wk_ref, bk_ref, wv_ref, bv_ref, wo_ref, bo_ref,
    # layernorm 1
    ln1w_ref, ln1b_ref,
    # MLP params (dense, densel)
    wd_ref, bd_ref, wdl_ref, bdl_ref,
    # layernorm 2
    ln2w_ref, ln2b_ref,
    # output
    out_ref,
    *, num_heads, d_k, b_blk, seq, d_model, d_pad,
):
    M = b_blk * seq
    q_flat = q_ref[...].reshape(M, d_pad)   # fold batch tile into matmul M dim
    k_flat = k_ref[...].reshape(M, d_pad)
    v_flat = v_ref[...].reshape(M, d_pad)

    scale = 1.0 / math.sqrt(d_k)

    # ---- Fused full-width Q/K/V projections (bf16 MXU, f32 accumulate) ------
    Q_all = _mm_nt_bf16(q_flat, wq_ref[...]) + bq_ref[...]     # (M, Dp) f32
    K_all = _mm_nt_bf16(k_flat, wk_ref[...]) + bk_ref[...]
    V_all = _mm_nt_bf16(v_flat, wv_ref[...]) + bv_ref[...]

    # bf16 once for the attention matmul operands; softmax math stays f32.
    Qb = Q_all.astype(jnp.bfloat16).reshape(b_blk, seq, d_pad)
    Kb = K_all.astype(jnp.bfloat16).reshape(b_blk, seq, d_pad)
    Vb = V_all.astype(jnp.bfloat16).reshape(b_blk, seq, d_pad)

    # ---- Per-head attention (heads are static lane-slices of the fused result) ----
    head_outs = []
    for h in range(num_heads):   # small static unroll (H=4 at these shapes)
        lo = h * d_k
        Qh = Qb[:, :, lo:lo + d_k]
        Kh = Kb[:, :, lo:lo + d_k]
        Vh = Vb[:, :, lo:lo + d_k]

        s = jnp.einsum('bqd,bkd->bqk', Qh, Kh,
                       preferred_element_type=jnp.float32) * scale   # (b, S, S) f32
        s = s - jnp.max(s, axis=-1, keepdims=True)
        p = jnp.exp(s)
        p = p * pl.reciprocal(jnp.sum(p, axis=-1, keepdims=True), approx=True)

        ob = jnp.einsum('bqk,bkd->bqd', p.astype(jnp.bfloat16), Vh,
                        preferred_element_type=jnp.float32)          # (b, S, d_k) f32
        head_outs.append(ob)

    # Lane-concat head outputs (plus a zero filler to d_pad) -> one full-width W_o GEMM.
    if d_pad > num_heads * d_k:
        head_outs.append(jnp.zeros((b_blk, seq, d_pad - num_heads * d_k), jnp.float32))
    attn_cat = jnp.concatenate(head_outs, axis=-1).reshape(M, d_pad)

    attn_out = _mm_nt_bf16(attn_cat, wo_ref[...]) + bo_ref[...]      # (M, Dp) f32

    # ---- Residual + LayerNorm 1 --------------------------------------------
    x = _layernorm_padded(q_flat + attn_out, ln1w_ref[...], ln1b_ref[...], d_model)

    # ---- MLP: densel(dropout(dense(x))) -------------------------------------
    h1 = _mm_nt_bf16(x, wd_ref[...]) + bd_ref[...]
    h2 = _mm_nt_bf16(h1, wdl_ref[...]) + bdl_ref[...]

    # ---- Residual + LayerNorm 2 --------------------------------------------
    out = _layernorm_padded(x + h2, ln2w_ref[...], ln2b_ref[...], d_model)
    out_ref[...] = out.reshape(b_blk, seq, d_pad)


def _tpu_vmem_bytes():
    """Per-chip VMEM capacity (falls back to a conservative 64 MiB if unavailable)."""
    try:
        info = pltpu.get_tpu_info()
        cap = getattr(info, "vmem_capacity_bytes", None)
        if cap:
            return int(cap)
    except Exception:
        pass
    return 64 * 1024 * 1024


def _choose_batch_block(batch, seq, target_rows):
    """Largest divisor of `batch` whose tile keeps Bblk*S <= target_rows, capped at B//2 so
    the 'parallel' grid axis has >=2 steps (both v7x TensorCores get work)."""
    max_bblk = max(1, batch // 2)
    best = 1
    for cand in range(1, max_bblk + 1):
        if batch % cand == 0 and cand * seq <= target_rows:
            best = cand
    return best


def transformer_block(query, key, value, params, *, num_heads):
    B, S, D = query.shape
    H = num_heads
    d_k = D // H
    Dp = ((D + 127) // 128) * 128           # lane-dense feature width

    vmem_cap = _tpu_vmem_bytes()
    target_rows = 1024 if vmem_cap >= 96 * (1 << 20) else 512   # per-chip tile sizing
    Bblk = _choose_batch_block(B, S, target_rows)
    vmem_limit = int(min(max(vmem_cap // 2, 32 * (1 << 20)), 100 * (1 << 20)))

    # ---- Host-side prep: zero-pad feature dims to Dp, cast weights to bf16 ----
    def pad_act(x):
        return jnp.pad(x.astype(jnp.float32), ((0, 0), (0, 0), (0, Dp - D)))

    def pad_w(w):   # (out, in) PyTorch layout -> (Dp, Dp) bf16, zero padded
        return jnp.pad(w, ((0, Dp - w.shape[0]), (0, Dp - w.shape[1]))).astype(jnp.bfloat16)

    def pad_b(b):   # (1, D) -> (1, Dp) f32, zero padded
        return jnp.pad(b, ((0, 0), (0, Dp - b.shape[1])))

    q_p, k_p, v_p = pad_act(query), pad_act(key), pad_act(value)

    act_spec = pl.BlockSpec((Bblk, S, Dp), lambda b: (b, 0, 0))

    def const_spec(*shape):
        zeros = (0,) * len(shape)
        # TODO(synk): pipeline_mode=pl.Buffered(1) here on v7x (grid-constant weights).
        return pl.BlockSpec(shape, lambda b: zeros)

    inputs = [
        (q_p, act_spec), (k_p, act_spec), (v_p, act_spec),
        (pad_w(params["wq"]), const_spec(Dp, Dp)), (pad_b(params["bq"]), const_spec(1, Dp)),
        (pad_w(params["wk"]), const_spec(Dp, Dp)), (pad_b(params["bk"]), const_spec(1, Dp)),
        (pad_w(params["wv"]), const_spec(Dp, Dp)), (pad_b(params["bv"]), const_spec(1, Dp)),
        (pad_w(params["wo"]), const_spec(Dp, Dp)), (pad_b(params["bo"]), const_spec(1, Dp)),
        (pad_b(params["ln1w"]), const_spec(1, Dp)), (pad_b(params["ln1b"]), const_spec(1, Dp)),
        (pad_w(params["wd"]), const_spec(Dp, Dp)), (pad_b(params["bd"]), const_spec(1, Dp)),
        (pad_w(params["wdl"]), const_spec(Dp, Dp)), (pad_b(params["bdl"]), const_spec(1, Dp)),
        (pad_b(params["ln2w"]), const_spec(1, Dp)), (pad_b(params["ln2b"]), const_spec(1, Dp)),
    ]
    vals = [v for v, _ in inputs]
    specs = [s for _, s in inputs]

    kernel = functools.partial(
        transformer_block_kernel,
        num_heads=H, d_k=d_k, b_blk=Bblk, seq=S, d_model=D, d_pad=Dp)

    out_pad = pl.pallas_call(
        kernel,
        out_shape=jax.ShapeDtypeStruct((B, S, Dp), jnp.float32),
        grid_spec=pltpu.PrefetchScalarGridSpec(
            num_scalar_prefetch=0,
            grid=(B // Bblk,),
            in_specs=specs,
            out_specs=pl.BlockSpec((Bblk, S, Dp), lambda b: (b, 0, 0)),
        ),
        compiler_params=pltpu.CompilerParams(
            dimension_semantics=("parallel",),   # batch tiles are independent (v7x megacore)
            vmem_limit_bytes=vmem_limit,
        ),
    )(*vals)

    return out_pad[..., :D]   # drop the lane padding


def init_params(key, embed_dim):
    D = embed_dim
    names_shapes = [
        ("wq", (D, D)), ("bq", (1, D)),
        ("wk", (D, D)), ("bk", (1, D)),
        ("wv", (D, D)), ("bv", (1, D)),
        ("wo", (D, D)), ("bo", (1, D)),
        ("wd", (D, D)), ("bd", (1, D)),
        ("wdl", (D, D)), ("bdl", (1, D)),
    ]
    params = {}
    keys = jax.random.split(key, len(names_shapes))
    bound = 1.0 / math.sqrt(D)  # PyTorch Linear default init range
    for (name, shape), k in zip(names_shapes, keys):
        params[name] = jax.random.uniform(k, shape, jnp.float32, -bound, bound)
    # LayerNorm affine params (PyTorch default: weight=1, bias=0)
    params["ln1w"] = jnp.ones((1, D), jnp.float32)
    params["ln1b"] = jnp.zeros((1, D), jnp.float32)
    params["ln2w"] = jnp.ones((1, D), jnp.float32)
    params["ln2b"] = jnp.zeros((1, D), jnp.float32)
    return params


def reference_forward(query, key, value, params, *, num_heads):
    """Pure-JAX f32 reference mirroring the PyTorch forward (dropout = identity, mask = ones)."""
    B, S, D = query.shape
    d_k = D // num_heads

    def lin(x, w, b):
        return x @ w.T + b

    def split_heads(x):
        return x.reshape(B, S, num_heads, d_k).transpose(0, 2, 1, 3)

    Q = split_heads(lin(query, params["wq"], params["bq"]))
    K = split_heads(lin(key, params["wk"], params["bk"]))
    V = split_heads(lin(value, params["wv"], params["bv"]))
    scores = jnp.einsum("bhqd,bhkd->bhqk", Q, K) / math.sqrt(d_k)
    probs = jax.nn.softmax(scores, axis=-1)
    attn = jnp.einsum("bhqk,bhkd->bhqd", probs, V)
    attn = attn.transpose(0, 2, 1, 3).reshape(B, S, D)
    attn = lin(attn, params["wo"], params["bo"])

    def ln(x, w, b, eps=1e-5):
        mu = jnp.mean(x, -1, keepdims=True)
        var = jnp.mean((x - mu) ** 2, -1, keepdims=True)
        return (x - mu) / jnp.sqrt(var + eps) * w + b

    x = ln(query + attn, params["ln1w"], params["ln1b"])
    h = lin(lin(x, params["wd"], params["bd"]), params["wdl"], params["bdl"])
    return ln(x + h, params["ln2w"], params["ln2b"])


if __name__ == "__main__":
    B, S, D, H = 2, 8, 32, 4

    root = jax.random.PRNGKey(0)
    kq, kk, kv, kp = jax.random.split(root, 4)
    query = jax.random.normal(kq, (B, S, D), jnp.float32)
    key = jax.random.normal(kk, (B, S, D), jnp.float32)
    value = jax.random.normal(kv, (B, S, D), jnp.float32)
    params = init_params(kp, D)

    out = transformer_block(query, key, value, params, num_heads=H)
    out = jax.block_until_ready(out)

    ref = reference_forward(query, key, value, params, num_heads=H)
    assert out.shape == (B, S, D)
    # Tolerance accounts for bf16 MXU operands (per the performance review) and the
    # hardware approximate reciprocal in the softmax denominator; accumulation is f32.
    err = float(jnp.max(jnp.abs(out - ref)))
    assert jnp.allclose(out, ref, atol=2e-2, rtol=2e-2), f"mismatch vs reference, max|diff|={err}"

    print("KERNEL_OK")
</pallas_src>

<mosaic_0001>
module attributes {stable_mosaic.version = 11 : i64} {
  func.func @transformer_block_kernel(%arg0: i32, %arg1: memref<1x8x128xf32, #tpu.memory_space<vmem>>, %arg2: memref<1x8x128xf32, #tpu.memory_space<vmem>>, %arg3: memref<1x8x128xf32, #tpu.memory_space<vmem>>, %arg4: memref<128x128xbf16, #tpu.memory_space<vmem>>, %arg5: memref<1x128xf32, #tpu.memory_space<vmem>>, %arg6: memref<128x128xbf16, #tpu.memory_space<vmem>>, %arg7: memref<1x128xf32, #tpu.memory_space<vmem>>, %arg8: memref<128x128xbf16, #tpu.memory_space<vmem>>, %arg9: memref<1x128xf32, #tpu.memory_space<vmem>>, %arg10: memref<128x128xbf16, #tpu.memory_space<vmem>>, %arg11: memref<1x128xf32, #tpu.memory_space<vmem>>, %arg12: memref<1x128xf32, #tpu.memory_space<vmem>>, %arg13: memref<1x128xf32, #tpu.memory_space<vmem>>, %arg14: memref<128x128xbf16, #tpu.memory_space<vmem>>, %arg15: memref<1x128xf32, #tpu.memory_space<vmem>>, %arg16: memref<128x128xbf16, #tpu.memory_space<vmem>>, %arg17: memref<1x128xf32, #tpu.memory_space<vmem>>, %arg18: memref<1x128xf32, #tpu.memory_space<vmem>>, %arg19: memref<1x128xf32, #tpu.memory_space<vmem>>, %arg20: memref<1x8x128xf32, #tpu.memory_space<vmem>>) attributes {dimension_semantics = [#tpu.dimension_semantics<parallel>], iteration_bounds = array<i64: 2>, scalar_prefetch = 0 : i64, scratch_operands = 0 : i64, tpu.core_type = #tpu.core_type<tc>, window_params = [{transform_indices = @transform_0, window_bounds = array<i64: 1, 8, 128>}, {transform_indices = @transform_1, window_bounds = array<i64: 1, 8, 128>}, {transform_indices = @transform_2, window_bounds = array<i64: 1, 8, 128>}, {pipeline_mode = #tpu.pipeline_mode<synchronous>, transform_indices = @transform_3, window_bounds = array<i64: 128, 128>}, {pipeline_mode = #tpu.pipeline_mode<synchronous>, transform_indices = @transform_4, window_bounds = array<i64: 1, 128>}, {pipeline_mode = #tpu.pipeline_mode<synchronous>, transform_indices = @transform_5, window_bounds = array<i64: 128, 128>}, {pipeline_mode = #tpu.pipeline_mode<synchronous>, transform_indices = @transform_6, window_bounds = array<i64: 1, 128>}, {pipeline_mode = #tpu.pipeline_mode<synchronous>, transform_indices = @transform_7, window_bounds = array<i64: 128, 128>}, {pipeline_mode = #tpu.pipeline_mode<synchronous>, transform_indices = @transform_8, window_bounds = array<i64: 1, 128>}, {pipeline_mode = #tpu.pipeline_mode<synchronous>, transform_indices = @transform_9, window_bounds = array<i64: 128, 128>}, {pipeline_mode = #tpu.pipeline_mode<synchronous>, transform_indices = @transform_10, window_bounds = array<i64: 1, 128>}, {pipeline_mode = #tpu.pipeline_mode<synchronous>, transform_indices = @transform_11, window_bounds = array<i64: 1, 128>}, {pipeline_mode = #tpu.pipeline_mode<synchronous>, transform_indices = @transform_12, window_bounds = array<i64: 1, 128>}, {pipeline_mode = #tpu.pipeline_mode<synchronous>, transform_indices = @transform_13, window_bounds = array<i64: 128, 128>}, {pipeline_mode = #tpu.pipeline_mode<synchronous>, transform_indices = @transform_14, window_bounds = array<i64: 1, 128>}, {pipeline_mode = #tpu.pipeline_mode<synchronous>, transform_indices = @transform_15, window_bounds = array<i64: 128, 128>}, {pipeline_mode = #tpu.pipeline_mode<synchronous>, transform_indices = @transform_16, window_bounds = array<i64: 1, 128>}, {pipeline_mode = #tpu.pipeline_mode<synchronous>, transform_indices = @transform_17, window_bounds = array<i64: 1, 128>}, {pipeline_mode = #tpu.pipeline_mode<synchronous>, transform_indices = @transform_18, window_bounds = array<i64: 1, 128>}, {transform_indices = @transform_19, window_bounds = array<i64: 1, 8, 128>}]} {
    %c0 = arith.constant 0 : index
    %c0_0 = arith.constant 0 : index
    %c0_1 = arith.constant 0 : index
    %0 = vector.load %arg1[%c0, %c0_0, %c0_1] : memref<1x8x128xf32, #tpu.memory_space<vmem>>, vector<1x8x128xf32>
    %1 = vector.shape_cast %0 : vector<1x8x128xf32> to vector<8x128xf32>
    %c0_2 = arith.constant 0 : index
    %c0_3 = arith.constant 0 : index
    %c0_4 = arith.constant 0 : index
    %2 = vector.load %arg2[%c0_2, %c0_3, %c0_4] : memref<1x8x128xf32, #tpu.memory_space<vmem>>, vector<1x8x128xf32>
    %3 = vector.shape_cast %2 : vector<1x8x128xf32> to vector<8x128xf32>
    %c0_5 = arith.constant 0 : index
    %c0_6 = arith.constant 0 : index
    %c0_7 = arith.constant 0 : index
    %4 = vector.load %arg3[%c0_5, %c0_6, %c0_7] : memref<1x8x128xf32, #tpu.memory_space<vmem>>, vector<1x8x128xf32>
    %5 = vector.shape_cast %4 : vector<1x8x128xf32> to vector<8x128xf32>
    %c0_8 = arith.constant 0 : index
    %c0_9 = arith.constant 0 : index
    %6 = vector.load %arg4[%c0_8, %c0_9] : memref<128x128xbf16, #tpu.memory_space<vmem>>, vector<128x128xbf16>
    %7 = arith.truncf %1 : vector<8x128xf32> to vector<8x128xbf16>
    %cst = arith.constant dense<0.000000e+00> : vector<8x128xf32>
    %8 = tpu.matmul %7, %6, %cst {dimension_numbers = #tpu.dot_dimension_numbers<[1], [1], [0], [0], [0, 0, 1, 0], [], []>} : vector<8x128xbf16>, vector<128x128xbf16>, vector<8x128xf32> -> vector<8x128xf32>
    %c0_10 = arith.constant 0 : index
    %c0_11 = arith.constant 0 : index
    %9 = vector.load %arg5[%c0_10, %c0_11] : memref<1x128xf32, #tpu.memory_space<vmem>>, vector<1x128xf32>
    %10 = vector.broadcast %9 : vector<1x128xf32> to vector<8x128xf32>
    %11 = arith.addf %8, %10 : vector<8x128xf32>
    %c0_12 = arith.constant 0 : index
    %c0_13 = arith.constant 0 : index
    %12 = vector.load %arg6[%c0_12, %c0_13] : memref<128x128xbf16, #tpu.memory_space<vmem>>, vector<128x128xbf16>
    %13 = arith.truncf %3 : vector<8x128xf32> to vector<8x128xbf16>
    %cst_14 = arith.constant dense<0.000000e+00> : vector<8x128xf32>
    %14 = tpu.matmul %13, %12, %cst_14 {dimension_numbers = #tpu.dot_dimension_numbers<[1], [1], [0], [0], [0, 0, 1, 0], [], []>} : vector<8x128xbf16>, vector<128x128xbf16>, vector<8x128xf32> -> vector<8x128xf32>
    %c0_15 = arith.constant 0 : index
    %c0_16 = arith.constant 0 : index
    %15 = vector.load %arg7[%c0_15, %c0_16] : memref<1x128xf32, #tpu.memory_space<vmem>>, vector<1x128xf32>
    %16 = vector.broadcast %15 : vector<1x128xf32> to vector<8x128xf32>
    %17 = arith.addf %14, %16 : vector<8x128xf32>
    %c0_17 = arith.constant 0 : index
    %c0_18 = arith.constant 0 : index
    %18 = vector.load %arg8[%c0_17, %c0_18] : memref<128x128xbf16, #tpu.memory_space<vmem>>, vector<128x128xbf16>
    %19 = arith.truncf %5 : vector<8x128xf32> to vector<8x128xbf16>
    %cst_19 = arith.constant dense<0.000000e+00> : vector<8x128xf32>
    %20 = tpu.matmul %19, %18, %cst_19 {dimension_numbers = #tpu.dot_dimension_numbers<[1], [1], [0], [0], [0, 0, 1, 0], [], []>} : vector<8x128xbf16>, vector<128x128xbf16>, vector<8x128xf32> -> vector<8x128xf32>
    %c0_20 = arith.constant 0 : index
    %c0_21 = arith.constant 0 : index
    %21 = vector.load %arg9[%c0_20, %c0_21] : memref<1x128xf32, #tpu.memory_space<vmem>>, vector<1x128xf32>
    %22 = vector.broadcast %21 : vector<1x128xf32> to vector<8x128xf32>
    %23 = arith.addf %20, %22 : vector<8x128xf32>
    %24 = arith.truncf %11 : vector<8x128xf32> to vector<8x128xbf16>
    %25 = vector.shape_cast %24 : vector<8x128xbf16> to vector<1x8x128xbf16>
    %26 = arith.truncf %17 : vector<8x128xf32> to vector<8x128xbf16>
    %27 = vector.shape_cast %26 : vector<8x128xbf16> to vector<1x8x128xbf16>
    %28 = arith.truncf %23 : vector<8x128xf32> to vector<8x128xbf16>
    %29 = vector.shape_cast %28 : vector<8x128xbf16> to vector<1x8x128xbf16>
    %30 = vector.extract_strided_slice %25 {offsets = [0, 0, 0], sizes = [1, 8, 8], strides = [1, 1, 1]} : vector<1x8x128xbf16> to vector<1x8x8xbf16>
    %31 = vector.extract_strided_slice %27 {offsets = [0, 0, 0], sizes = [1, 8, 8], strides = [1, 1, 1]} : vector<1x8x128xbf16> to vector<1x8x8xbf16>
    %32 = vector.extract_strided_slice %29 {offsets = [0, 0, 0], sizes = [1, 8, 8], strides = [1, 1, 1]} : vector<1x8x128xbf16> to vector<1x8x8xbf16>
    "tpu.trace_start"() <{level = 10 : i32, message = "bqd,bkd->bqk"}> : () -> ()
    %cst_22 = arith.constant dense<0.000000e+00> : vector<1x8x8xf32>
    %33 = tpu.matmul %30, %31, %cst_22 {dimension_numbers = #tpu.dot_dimension_numbers<[2], [2], [1], [1], [0, 0, 0, 1, 1, 1], [0], [0]>} : vector<1x8x8xbf16>, vector<1x8x8xbf16>, vector<1x8x8xf32> -> vector<1x8x8xf32>
    "tpu.trace_stop"() : () -> ()
    %cst_23 = arith.constant 0.353553385 : f32
    %34 = vector.broadcast %cst_23 : f32 to vector<1x8x8xf32>
    %35 = arith.mulf %33, %34 : vector<1x8x8xf32>
    %cst_24 = arith.constant dense<0xFF800000> : vector<1x8xf32>
    %36 = vector.multi_reduction <maximumf>, %35, %cst_24 [2] : vector<1x8x8xf32> to vector<1x8xf32>
    %37 = vector.shape_cast %36 : vector<1x8xf32> to vector<1x8x1xf32>
    %38 = vector.broadcast %37 : vector<1x8x1xf32> to vector<1x8x8xf32>
    %39 = arith.subf %35, %38 : vector<1x8x8xf32>
    %40 = math.exp %39 : vector<1x8x8xf32>
    %cst_25 = arith.constant dense<0.000000e+00> : vector<1x8xf32>
    %41 = vector.multi_reduction <add>, %40, %cst_25 [2] : vector<1x8x8xf32> to vector<1x8xf32>
    %42 = vector.shape_cast %41 : vector<1x8xf32> to vector<1x8x1xf32>
    %43 = tpu.reciprocal %42 {approx = true} : vector<1x8x1xf32> -> vector<1x8x1xf32>
    %44 = vector.broadcast %43 : vector<1x8x1xf32> to vector<1x8x8xf32>
    %45 = arith.mulf %40, %44 : vector<1x8x8xf32>
    %46 = arith.truncf %45 : vector<1x8x8xf32> to vector<1x8x8xbf16>
    "tpu.trace_start"() <{level = 10 : i32, message = "bqk,bkd->bqd"}> : () -> ()
    %cst_26 = arith.constant dense<0.000000e+00> : vector<1x8x8xf32>
    %47 = tpu.matmul %46, %32, %cst_26 {dimension_numbers = #tpu.dot_dimension_numbers<[2], [1], [1], [2], [0, 0, 0, 1, 1, 2], [0], [0]>} : vector<1x8x8xbf16>, vector<1x8x8xbf16>, vector<1x8x8xf32> -> vector<1x8x8xf32>
    "tpu.trace_stop"() : () -> ()
    %48 = vector.extract_strided_slice %25 {offsets = [0, 0, 8], sizes = [1, 8, 8], strides = [1, 1, 1]} : vector<1x8x128xbf16> to vector<1x8x8xbf16>
    %49 = vector.extract_strided_slice %27 {offsets = [0, 0, 8], sizes = [1, 8, 8], strides = [1, 1, 1]} : vector<1x8x128xbf16> to vector<1x8x8xbf16>
    %50 = vector.extract_strided_slice %29 {offsets = [0, 0, 8], sizes = [1, 8, 8], strides = [1, 1, 1]} : vector<1x8x128xbf16> to vector<1x8x8xbf16>
    "tpu.trace_start"() <{level = 10 : i32, message = "bqd,bkd->bqk"}> : () -> ()
    %cst_27 = arith.constant dense<0.000000e+00> : vector<1x8x8xf32>
    %51 = tpu.matmul %48, %49, %cst_27 {dimension_numbers = #tpu.dot_dimension_numbers<[2], [2], [1], [1], [0, 0, 0, 1, 1, 1], [0], [0]>} : vector<1x8x8xbf16>, vector<1x8x8xbf16>, vector<1x8x8xf32> -> vector<1x8x8xf32>
    "tpu.trace_stop"() : () -> ()
    %cst_28 = arith.constant 0.353553385 : f32
    %52 = vector.broadcast %cst_28 : f32 to vector<1x8x8xf32>
    %53 = arith.mulf %51, %52 : vector<1x8x8xf32>
    %cst_29 = arith.constant dense<0xFF800000> : vector<1x8xf32>
    %54 = vector.multi_reduction <maximumf>, %53, %cst_29 [2] : vector<1x8x8xf32> to vector<1x8xf32>
    %55 = vector.shape_cast %54 : vector<1x8xf32> to vector<1x8x1xf32>
    %56 = vector.broadcast %55 : vector<1x8x1xf32> to vector<1x8x8xf32>
    %57 = arith.subf %53, %56 : vector<1x8x8xf32>
    %58 = math.exp %57 : vector<1x8x8xf32>
    %cst_30 = arith.constant dense<0.000000e+00> : vector<1x8xf32>
    %59 = vector.multi_reduction <add>, %58, %cst_30 [2] : vector<1x8x8xf32> to vector<1x8xf32>
    %60 = vector.shape_cast %59 : vector<1x8xf32> to vector<1x8x1xf32>
    %61 = tpu.reciprocal %60 {approx = true} : vector<1x8x1xf32> -> vector<1x8x1xf32>
    %62 = vector.broadcast %61 : vector<1x8x1xf32> to vector<1x8x8xf32>
    %63 = arith.mulf %58, %62 : vector<1x8x8xf32>
    %64 = arith.truncf %63 : vector<1x8x8xf32> to vector<1x8x8xbf16>
    "tpu.trace_start"() <{level = 10 : i32, message = "bqk,bkd->bqd"}> : () -> ()
    %cst_31 = arith.constant dense<0.000000e+00> : vector<1x8x8xf32>
    %65 = tpu.matmul %64, %50, %cst_31 {dimension_numbers = #tpu.dot_dimension_numbers<[2], [1], [1], [2], [0, 0, 0, 1, 1, 2], [0], [0]>} : vector<1x8x8xbf16>, vector<1x8x8xbf16>, vector<1x8x8xf32> -> vector<1x8x8xf32>
    "tpu.trace_stop"() : () -> ()
    %66 = vector.extract_strided_slice %25 {offsets = [0, 0, 16], sizes = [1, 8, 8], strides = [1, 1, 1]} : vector<1x8x128xbf16> to vector<1x8x8xbf16>
    %67 = vector.extract_strided_slice %27 {offsets = [0, 0, 16], sizes = [1, 8, 8], strides = [1, 1, 1]} : vector<1x8x128xbf16> to vector<1x8x8xbf16>
    %68 = vector.extract_strided_slice %29 {offsets = [0, 0, 16], sizes = [1, 8, 8], strides = [1, 1, 1]} : vector<1x8x128xbf16> to vector<1x8x8xbf16>
    "tpu.trace_start"() <{level = 10 : i32, message = "bqd,bkd->bqk"}> : () -> ()
    %cst_32 = arith.constant dense<0.000000e+00> : vector<1x8x8xf32>
    %69 = tpu.matmul %66, %67, %cst_32 {dimension_numbers = #tpu.dot_dimension_numbers<[2], [2], [1], [1], [0, 0, 0, 1, 1, 1], [0], [0]>} : vector<1x8x8xbf16>, vector<1x8x8xbf16>, vector<1x8x8xf32> -> vector<1x8x8xf32>
    "tpu.trace_stop"() : () -> ()
    %cst_33 = arith.constant 0.353553385 : f32
    %70 = vector.broadcast %cst_33 : f32 to vector<1x8x8xf32>
    %71 = arith.mulf %69, %70 : vector<1x8x8xf32>
    %cst_34 = arith.constant dense<0xFF800000> : vector<1x8xf32>
    %72 = vector.multi_reduction <maximumf>, %71, %cst_34 [2] : vector<1x8x8xf32> to vector<1x8xf32>
    %73 = vector.shape_cast %72 : vector<1x8xf32> to vector<1x8x1xf32>
    %74 = vector.broadcast %73 : vector<1x8x1xf32> to vector<1x8x8xf32>
    %75 = arith.subf %71, %74 : vector<1x8x8xf32>
    %76 = math.exp %75 : vector<1x8x8xf32>
    %cst_35 = arith.constant dense<0.000000e+00> : vector<1x8xf32>
    %77 = vector.multi_reduction <add>, %76, %cst_35 [2] : vector<1x8x8xf32> to vector<1x8xf32>
    %78 = vector.shape_cast %77 : vector<1x8xf32> to vector<1x8x1xf32>
    %79 = tpu.reciprocal %78 {approx = true} : vector<1x8x1xf32> -> vector<1x8x1xf32>
    %80 = vector.broadcast %79 : vector<1x8x1xf32> to vector<1x8x8xf32>
    %81 = arith.mulf %76, %80 : vector<1x8x8xf32>
    %82 = arith.truncf %81 : vector<1x8x8xf32> to vector<1x8x8xbf16>
    "tpu.trace_start"() <{level = 10 : i32, message = "bqk,bkd->bqd"}> : () -> ()
    %cst_36 = arith.constant dense<0.000000e+00> : vector<1x8x8xf32>
    %83 = tpu.matmul %82, %68, %cst_36 {dimension_numbers = #tpu.dot_dimension_numbers<[2], [1], [1], [2], [0, 0, 0, 1, 1, 2], [0], [0]>} : vector<1x8x8xbf16>, vector<1x8x8xbf16>, vector<1x8x8xf32> -> vector<1x8x8xf32>
    "tpu.trace_stop"() : () -> ()
    %84 = vector.extract_strided_slice %25 {offsets = [0, 0, 24], sizes = [1, 8, 8], strides = [1, 1, 1]} : vector<1x8x128xbf16> to vector<1x8x8xbf16>
    %85 = vector.extract_strided_slice %27 {offsets = [0, 0, 24], sizes = [1, 8, 8], strides = [1, 1, 1]} : vector<1x8x128xbf16> to vector<1x8x8xbf16>
    %86 = vector.extract_strided_slice %29 {offsets = [0, 0, 24], sizes = [1, 8, 8], strides = [1, 1, 1]} : vector<1x8x128xbf16> to vector<1x8x8xbf16>
    "tpu.trace_start"() <{level = 10 : i32, message = "bqd,bkd->bqk"}> : () -> ()
    %cst_37 = arith.constant dense<0.000000e+00> : vector<1x8x8xf32>
    %87 = tpu.matmul %84, %85, %cst_37 {dimension_numbers = #tpu.dot_dimension_numbers<[2], [2], [1], [1], [0, 0, 0, 1, 1, 1], [0], [0]>} : vector<1x8x8xbf16>, vector<1x8x8xbf16>, vector<1x8x8xf32> -> vector<1x8x8xf32>
    "tpu.trace_stop"() : () -> ()
    %cst_38 = arith.constant 0.353553385 : f32
    %88 = vector.broadcast %cst_38 : f32 to vector<1x8x8xf32>
    %89 = arith.mulf %87, %88 : vector<1x8x8xf32>
    %cst_39 = arith.constant dense<0xFF800000> : vector<1x8xf32>
    %90 = vector.multi_reduction <maximumf>, %89, %cst_39 [2] : vector<1x8x8xf32> to vector<1x8xf32>
    %91 = vector.shape_cast %90 : vector<1x8xf32> to vector<1x8x1xf32>
    %92 = vector.broadcast %91 : vector<1x8x1xf32> to vector<1x8x8xf32>
    %93 = arith.subf %89, %92 : vector<1x8x8xf32>
    %94 = math.exp %93 : vector<1x8x8xf32>
    %cst_40 = arith.constant dense<0.000000e+00> : vector<1x8xf32>
    %95 = vector.multi_reduction <add>, %94, %cst_40 [2] : vector<1x8x8xf32> to vector<1x8xf32>
    %96 = vector.shape_cast %95 : vector<1x8xf32> to vector<1x8x1xf32>
    %97 = tpu.reciprocal %96 {approx = true} : vector<1x8x1xf32> -> vector<1x8x1xf32>
    %98 = vector.broadcast %97 : vector<1x8x1xf32> to vector<1x8x8xf32>
    %99 = arith.mulf %94, %98 : vector<1x8x8xf32>
    %100 = arith.truncf %99 : vector<1x8x8xf32> to vector<1x8x8xbf16>
    "tpu.trace_start"() <{level = 10 : i32, message = "bqk,bkd->bqd"}> : () -> ()
    %cst_41 = arith.constant dense<0.000000e+00> : vector<1x8x8xf32>
    %101 = tpu.matmul %100, %86, %cst_41 {dimension_numbers = #tpu.dot_dimension_numbers<[2], [1], [1], [2], [0, 0, 0, 1, 1, 2], [0], [0]>} : vector<1x8x8xbf16>, vector<1x8x8xbf16>, vector<1x8x8xf32> -> vector<1x8x8xf32>
    %cst_42 = arith.constant 0.000000e+00 : f32
    "tpu.trace_stop"() : () -> ()
    %102 = vector.broadcast %cst_42 : f32 to vector<1x8x96xf32>
    %103 = tpu.concatenate %47, %65, %83, %101, %102 in 2 : vector<1x8x8xf32>, vector<1x8x8xf32>, vector<1x8x8xf32>, vector<1x8x8xf32>, vector<1x8x96xf32> -> vector<1x8x128xf32>
    %104 = vector.shape_cast %103 : vector<1x8x128xf32> to vector<8x128xf32>
    %c0_43 = arith.constant 0 : index
    %c0_44 = arith.constant 0 : index
    %105 = vector.load %arg10[%c0_43, %c0_44] : memref<128x128xbf16, #tpu.memory_space<vmem>>, vector<128x128xbf16>
    %106 = arith.truncf %104 : vector<8x128xf32> to vector<8x128xbf16>
    %cst_45 = arith.constant dense<0.000000e+00> : vector<8x128xf32>
    %107 = tpu.matmul %106, %105, %cst_45 {dimension_numbers = #tpu.dot_dimension_numbers<[1], [1], [0], [0], [0, 0, 1, 0], [], []>} : vector<8x128xbf16>, vector<128x128xbf16>, vector<8x128xf32> -> vector<8x128xf32>
    %c0_46 = arith.constant 0 : index
    %c0_47 = arith.constant 0 : index
    %108 = vector.load %arg11[%c0_46, %c0_47] : memref<1x128xf32, #tpu.memory_space<vmem>>, vector<1x128xf32>
    %109 = vector.broadcast %108 : vector<1x128xf32> to vector<8x128xf32>
    %110 = arith.addf %107, %109 : vector<8x128xf32>
    %111 = arith.addf %1, %110 : vector<8x128xf32>
    %c0_48 = arith.constant 0 : index
    %c0_49 = arith.constant 0 : index
    %112 = vector.load %arg12[%c0_48, %c0_49] : memref<1x128xf32, #tpu.memory_space<vmem>>, vector<1x128xf32>
    %c0_50 = arith.constant 0 : index
    %c0_51 = arith.constant 0 : index
    %113 = vector.load %arg13[%c0_50, %c0_51] : memref<1x128xf32, #tpu.memory_space<vmem>>, vector<1x128xf32>
    %cst_52 = arith.constant dense<0.000000e+00> : vector<8xf32>
    %114 = vector.multi_reduction <add>, %111, %cst_52 [1] : vector<8x128xf32> to vector<8xf32>
    %115 = vector.shape_cast %114 : vector<8xf32> to vector<8x1xf32>
    %116 = arith.mulf %111, %111 : vector<8x128xf32>
    %cst_53 = arith.constant dense<0.000000e+00> : vector<8xf32>
    %117 = vector.multi_reduction <add>, %116, %cst_53 [1] : vector<8x128xf32> to vector<8xf32>
    %118 = vector.shape_cast %117 : vector<8xf32> to vector<8x1xf32>
    %cst_54 = arith.constant 3.200000e+01 : f32
    %119 = vector.broadcast %cst_54 : f32 to vector<8x1xf32>
    %120 = arith.divf %115, %119 : vector<8x1xf32>
    %cst_55 = arith.constant 3.200000e+01 : f32
    %121 = vector.broadcast %cst_55 : f32 to vector<8x1xf32>
    %122 = arith.divf %118, %121 : vector<8x1xf32>
    %123 = arith.mulf %120, %120 : vector<8x1xf32>
    %124 = arith.subf %122, %123 : vector<8x1xf32>
    %125 = vector.broadcast %120 : vector<8x1xf32> to vector<8x128xf32>
    %126 = arith.subf %111, %125 : vector<8x128xf32>
    %cst_56 = arith.constant 9.99999974E-6 : f32
    %127 = vector.broadcast %cst_56 : f32 to vector<8x1xf32>
    %128 = arith.addf %124, %127 : vector<8x1xf32>
    %129 = math.rsqrt %128 : vector<8x1xf32>
    %130 = vector.broadcast %129 : vector<8x1xf32> to vector<8x128xf32>
    %131 = arith.mulf %126, %130 : vector<8x128xf32>
    %132 = vector.broadcast %112 : vector<1x128xf32> to vector<8x128xf32>
    %133 = arith.mulf %131, %132 : vector<8x128xf32>
    %134 = vector.broadcast %113 : vector<1x128xf32> to vector<8x128xf32>
    %135 = arith.addf %133, %134 : vector<8x128xf32>
    %c0_57 = arith.constant 0 : index
    %c0_58 = arith.constant 0 : index
    %136 = vector.load %arg14[%c0_57, %c0_58] : memref<128x128xbf16, #tpu.memory_space<vmem>>, vector<128x128xbf16>
    %137 = arith.truncf %135 : vector<8x128xf32> to vector<8x128xbf16>
    %cst_59 = arith.constant dense<0.000000e+00> : vector<8x128xf32>
    %138 = tpu.matmul %137, %136, %cst_59 {dimension_numbers = #tpu.dot_dimension_numbers<[1], [1], [0], [0], [0, 0, 1, 0], [], []>} : vector<8x128xbf16>, vector<128x128xbf16>, vector<8x128xf32> -> vector<8x128xf32>
    %c0_60 = arith.constant 0 : index
    %c0_61 = arith.constant 0 : index
    %139 = vector.load %arg15[%c0_60, %c0_61] : memref<1x128xf32, #tpu.memory_space<vmem>>, vector<1x128xf32>
    %140 = vector.broadcast %139 : vector<1x128xf32> to vector<8x128xf32>
    %141 = arith.addf %138, %140 : vector<8x128xf32>
    %c0_62 = arith.constant 0 : index
    %c0_63 = arith.constant 0 : index
    %142 = vector.load %arg16[%c0_62, %c0_63] : memref<128x128xbf16, #tpu.memory_space<vmem>>, vector<128x128xbf16>
    %143 = arith.truncf %141 : vector<8x128xf32> to vector<8x128xbf16>
    %cst_64 = arith.constant dense<0.000000e+00> : vector<8x128xf32>
    %144 = tpu.matmul %143, %142, %cst_64 {dimension_numbers = #tpu.dot_dimension_numbers<[1], [1], [0], [0], [0, 0, 1, 0], [], []>} : vector<8x128xbf16>, vector<128x128xbf16>, vector<8x128xf32> -> vector<8x128xf32>
    %c0_65 = arith.constant 0 : index
    %c0_66 = arith.constant 0 : index
    %145 = vector.load %arg17[%c0_65, %c0_66] : memref<1x128xf32, #tpu.memory_space<vmem>>, vector<1x128xf32>
    %146 = vector.broadcast %145 : vector<1x128xf32> to vector<8x128xf32>
    %147 = arith.addf %144, %146 : vector<8x128xf32>
    %148 = arith.addf %135, %147 : vector<8x128xf32>
    %c0_67 = arith.constant 0 : index
    %c0_68 = arith.constant 0 : index
    %149 = vector.load %arg18[%c0_67, %c0_68] : memref<1x128xf32, #tpu.memory_space<vmem>>, vector<1x128xf32>
    %c0_69 = arith.constant 0 : index
    %c0_70 = arith.constant 0 : index
    %150 = vector.load %arg19[%c0_69, %c0_70] : memref<1x128xf32, #tpu.memory_space<vmem>>, vector<1x128xf32>
    %cst_71 = arith.constant dense<0.000000e+00> : vector<8xf32>
    %151 = vector.multi_reduction <add>, %148, %cst_71 [1] : vector<8x128xf32> to vector<8xf32>
    %152 = vector.shape_cast %151 : vector<8xf32> to vector<8x1xf32>
    %153 = arith.mulf %148, %148 : vector<8x128xf32>
    %cst_72 = arith.constant dense<0.000000e+00> : vector<8xf32>
    %154 = vector.multi_reduction <add>, %153, %cst_72 [1] : vector<8x128xf32> to vector<8xf32>
    %155 = vector.shape_cast %154 : vector<8xf32> to vector<8x1xf32>
    %cst_73 = arith.constant 3.200000e+01 : f32
    %156 = vector.broadcast %cst_73 : f32 to vector<8x1xf32>
    %157 = arith.divf %152, %156 : vector<8x1xf32>
    %cst_74 = arith.constant 3.200000e+01 : f32
    %158 = vector.broadcast %cst_74 : f32 to vector<8x1xf32>
    %159 = arith.divf %155, %158 : vector<8x1xf32>
    %160 = arith.mulf %157, %157 : vector<8x1xf32>
    %161 = arith.subf %159, %160 : vector<8x1xf32>
    %162 = vector.broadcast %157 : vector<8x1xf32> to vector<8x128xf32>
    %163 = arith.subf %148, %162 : vector<8x128xf32>
    %cst_75 = arith.constant 9.99999974E-6 : f32
    %164 = vector.broadcast %cst_75 : f32 to vector<8x1xf32>
    %165 = arith.addf %161, %164 : vector<8x1xf32>
    %166 = math.rsqrt %165 : vector<8x1xf32>
    %167 = vector.broadcast %166 : vector<8x1xf32> to vector<8x128xf32>
    %168 = arith.mulf %163, %167 : vector<8x128xf32>
    %169 = vector.broadcast %149 : vector<1x128xf32> to vector<8x128xf32>
    %170 = arith.mulf %168, %169 : vector<8x128xf32>
    %171 = vector.broadcast %150 : vector<1x128xf32> to vector<8x128xf32>
    %172 = arith.addf %170, %171 : vector<8x128xf32>
    %173 = vector.shape_cast %172 : vector<8x128xf32> to vector<1x8x128xf32>
    %c0_76 = arith.constant 0 : index
    %c0_77 = arith.constant 0 : index
    %c0_78 = arith.constant 0 : index
    %174 = vector.load %arg20[%c0_76, %c0_77, %c0_78] : memref<1x8x128xf32, #tpu.memory_space<vmem>>, vector<1x8x128xf32>
    tpu.vector_store %arg20[%c0_76, %c0_77, %c0_78], %173 {strides = array<i32>} : memref<1x8x128xf32, #tpu.memory_space<vmem>>, vector<1x8x128xf32>,
    return
  }
  func.func @transform_0(%arg0: i32) -> (i32, i32, i32) {
    %c0_i32 = arith.constant 0 : i32
    %c0_i32_0 = arith.constant 0 : i32
    %c0_i32_1 = arith.constant 0 : i32
    return %arg0, %c0_i32, %c0_i32_0 : i32, i32, i32
  }
  func.func @transform_1(%arg0: i32) -> (i32, i32, i32) {
    %c0_i32 = arith.constant 0 : i32
    %c0_i32_0 = arith.constant 0 : i32
    %c0_i32_1 = arith.constant 0 : i32
    return %arg0, %c0_i32, %c0_i32_0 : i32, i32, i32
  }
  func.func @transform_2(%arg0: i32) -> (i32, i32, i32) {
    %c0_i32 = arith.constant 0 : i32
    %c0_i32_0 = arith.constant 0 : i32
    %c0_i32_1 = arith.constant 0 : i32
    return %arg0, %c0_i32, %c0_i32_0 : i32, i32, i32
  }
  func.func @transform_3(%arg0: i32) -> (i32, i32) {
    %c0_i32 = arith.constant 0 : i32
    %c0_i32_0 = arith.constant 0 : i32
    %c0_i32_1 = arith.constant 0 : i32
    return %c0_i32, %c0_i32_0 : i32, i32
  }
  func.func @transform_4(%arg0: i32) -> (i32, i32) {
    %c0_i32 = arith.constant 0 : i32
    %c0_i32_0 = arith.constant 0 : i32
    %c0_i32_1 = arith.constant 0 : i32
    return %c0_i32, %c0_i32_0 : i32, i32
  }
  func.func @transform_5(%arg0: i32) -> (i32, i32) {
    %c0_i32 = arith.constant 0 : i32
    %c0_i32_0 = arith.constant 0 : i32
    %c0_i32_1 = arith.constant 0 : i32
    return %c0_i32, %c0_i32_0 : i32, i32
  }
  func.func @transform_6(%arg0: i32) -> (i32, i32) {
    %c0_i32 = arith.constant 0 : i32
    %c0_i32_0 = arith.constant 0 : i32
    %c0_i32_1 = arith.constant 0 : i32
    return %c0_i32, %c0_i32_0 : i32, i32
  }
  func.func @transform_7(%arg0: i32) -> (i32, i32) {
    %c0_i32 = arith.constant 0 : i32
    %c0_i32_0 = arith.constant 0 : i32
    %c0_i32_1 = arith.constant 0 : i32
    return %c0_i32, %c0_i32_0 : i32, i32
  }
  func.func @transform_8(%arg0: i32) -> (i32, i32) {
    %c0_i32 = arith.constant 0 : i32
    %c0_i32_0 = arith.constant 0 : i32
    %c0_i32_1 = arith.constant 0 : i32
    return %c0_i32, %c0_i32_0 : i32, i32
  }
  func.func @transform_9(%arg0: i32) -> (i32, i32) {
    %c0_i32 = arith.constant 0 : i32
    %c0_i32_0 = arith.constant 0 : i32
    %c0_i32_1 = arith.constant 0 : i32
    return %c0_i32, %c0_i32_0 : i32, i32
  }
  func.func @transform_10(%arg0: i32) -> (i32, i32) {
    %c0_i32 = arith.constant 0 : i32
    %c0_i32_0 = arith.constant 0 : i32
    %c0_i32_1 = arith.constant 0 : i32
    return %c0_i32, %c0_i32_0 : i32, i32
  }
  func.func @transform_11(%arg0: i32) -> (i32, i32) {
    %c0_i32 = arith.constant 0 : i32
    %c0_i32_0 = arith.constant 0 : i32
    %c0_i32_1 = arith.constant 0 : i32
    return %c0_i32, %c0_i32_0 : i32, i32
  }
  func.func @transform_12(%arg0: i32) -> (i32, i32) {
    %c0_i32 = arith.constant 0 : i32
    %c0_i32_0 = arith.constant 0 : i32
    %c0_i32_1 = arith.constant 0 : i32
    return %c0_i32, %c0_i32_0 : i32, i32
  }
  func.func @transform_13(%arg0: i32) -> (i32, i32) {
    %c0_i32 = arith.constant 0 : i32
    %c0_i32_0 = arith.constant 0 : i32
    %c0_i32_1 = arith.constant 0 : i32
    return %c0_i32, %c0_i32_0 : i32, i32
  }
  func.func @transform_14(%arg0: i32) -> (i32, i32) {
    %c0_i32 = arith.constant 0 : i32
    %c0_i32_0 = arith.constant 0 : i32
    %c0_i32_1 = arith.constant 0 : i32
    return %c0_i32, %c0_i32_0 : i32, i32
  }
  func.func @transform_15(%arg0: i32) -> (i32, i32) {
    %c0_i32 = arith.constant 0 : i32
    %c0_i32_0 = arith.constant 0 : i32
    %c0_i32_1 = arith.constant 0 : i32
    return %c0_i32, %c0_i32_0 : i32, i32
  }
  func.func @transform_16(%arg0: i32) -> (i32, i32) {
    %c0_i32 = arith.constant 0 : i32
    %c0_i32_0 = arith.constant 0 : i32
    %c0_i32_1 = arith.constant 0 : i32
    return %c0_i32, %c0_i32_0 : i32, i32
  }
  func.func @transform_17(%arg0: i32) -> (i32, i32) {
    %c0_i32 = arith.constant 0 : i32
    %c0_i32_0 = arith.constant 0 : i32
    %c0_i32_1 = arith.constant 0 : i32
    return %c0_i32, %c0_i32_0 : i32, i32
  }
  func.func @transform_18(%arg0: i32) -> (i32, i32) {
    %c0_i32 = arith.constant 0 : i32
    %c0_i32_0 = arith.constant 0 : i32
    %c0_i32_1 = arith.constant 0 : i32
    return %c0_i32, %c0_i32_0 : i32, i32
  }
  func.func @transform_19(%arg0: i32) -> (i32, i32, i32) {
    %c0_i32 = arith.constant 0 : i32
    %c0_i32_0 = arith.constant 0 : i32
    %c0_i32_1 = arith.constant 0 : i32
    return %arg0, %c0_i32, %c0_i32_0 : i32, i32, i32
  }
}

</mosaic_0001>

<bundles_post_ra>
// kernel: tpu_custom_call.1
= control target key start
LH: loop header
LB: loop body
LE: loop exit
PB: predicated region body
PF: predicated region fallthrough
CT: control target
= control target key end

     0   :  { %s3739_s0 = inlined_call_operand.hbm [shape: f32[2,8,128], index: 0, kind: input, shape index: {}]   ;;  %s3740_s1 = inlined_call_operand.hbm [shape: f32[2,8,128], index: 1, kind: input, shape index: {}]   ;;  %s3741_s2 = inlined_call_operand.hbm [shape: f32[2,8,128], index: 2, kind: input, shape index: {}]   ;;  %s3742_s3 = inlined_call_operand.hbm [shape: bf16[128,128], index: 3, kind: input, shape index: {}]   ;;  %s3743_s4 = inlined_call_operand.vmem [shape: f32[1,128], index: 4, kind: input, shape index: {}]   ;;  %s3744_s5 = inlined_call_operand.hbm [shape: bf16[128,128], index: 5, kind: input, shape index: {}]   ;;  %s3745_s6 = inlined_call_operand.vmem [shape: f32[1,128], index: 6, kind: input, shape index: {}]   ;;  %s3746_s7 = inlined_call_operand.hbm [shape: bf16[128,128], index: 7, kind: input, shape index: {}]   ;;  %s3747_s8 = inlined_call_operand.vmem [shape: f32[1,128], index: 8, kind: input, shape index: {}]   ;;  %s3748_s9 = inlined_call_operand.hbm [shape: bf16[128,128], index: 9, kind: input, shape index: {}]   ;;  %s3749_s10 = inlined_call_operand.vmem [shape: f32[1,128], index: 10, kind: input, shape index: {}]   ;;  %s3750_s11 = inlined_call_operand.vmem [shape: f32[1,128], index: 11, kind: input, shape index: {}]   ;;  %s3751_s12 = inlined_call_operand.vmem [shape: f32[1,128], index: 12, kind: input, shape index: {}]   ;;  %s3752_s13 = inlined_call_operand.hbm [shape: bf16[128,128], index: 13, kind: input, shape index: {}]   ;;  %s3753_s14 = inlined_call_operand.vmem [shape: f32[1,128], index: 14, kind: input, shape index: {}]   ;;  %s3754_s15 = inlined_call_operand.hbm [shape: bf16[128,128], index: 15, kind: input, shape index: {}]   ;;  %s3755_s16 = inlined_call_operand.vmem [shape: f32[1,128], index: 16, kind: input, shape index: {}]   ;;  %s3756_s17 = inlined_call_operand.vmem [shape: f32[1,128], index: 17, kind: input, shape index: {}]   ;;  %s3757_s18 = inlined_call_operand.vmem [shape: f32[1,128], index: 18, kind: input, shape index: {}]   ;;  %s3758_s19 = inlined_call_operand.hbm [shape: f32[2,8,128], index: 19, kind: output, shape index: {}]  }
   0x1   :  { %3790 = sst [smem:[#allocation30_spill]] %s3739_s0 }
   0x2   :  { %3791 = sst [smem:[#allocation31_spill]] %s3740_s1 }
   0x3   :  { %3792 = sst [smem:[#allocation32_spill]] %s3741_s2 }
   0x4   :  { %3793 = sst [smem:[#allocation33_spill]] %s3742_s3 }
   0x5   :  { %3794 = sst [smem:[#allocation34_spill]] %s3744_s5 }
   0x6   :  { %3795 = sst [smem:[#allocation35_spill]] %s3746_s7 }
   0x7   :  { %3796 = sst [smem:[#allocation36_spill]] %s3749_s10 }
   0x8   :  { %3797 = sst [smem:[#allocation37_spill]] %s3750_s11 }
   0x9   :  { %3798 = sst [smem:[#allocation38_spill]] %s3751_s12 }
   0xa   :  { %3799 = sst [smem:[#allocation39_spill]] %s3752_s13 }
   0xb   :  { %3800 = sst [smem:[#allocation40_spill]] %s3753_s14 }
   0xc   :  { %3801 = sst [smem:[#allocation41_spill]] %s3755_s16 }
   0xd   :  { %3802 = sst [smem:[#allocation42_spill]] %s3756_s17 }
   0xe   :  { %3803 = sst [smem:[#allocation43_spill]] %s3757_s18 }
   0xf   :  { %3804 = sst [smem:[#allocation44_spill]] %s3758_s19 }
  0x10   :  { %24 = vsyncpa [#allocation3], 0 }
  0x11   :  { %26 = vsyncpa [#allocation3 + $0x1], 0 }
  0x12   :  { %27 = vsyncpa [#allocation6], 0 }
  0x13   :  { %29 = vsyncpa [#allocation6 + $0x1], 0 }
  0x14   :  { %30 = vsyncpa [#allocation9], 0 }
  0x15   :  { %31 = vsyncpa [#allocation12], 0 }
  0x16   :  { %32 = vsyncpa [#allocation15], 0 }
  0x17   :  { %33 = vsyncpa [#allocation4], 0 }
  0x18   :  { %35 = vsyncpa [#allocation4 + $0x1], 0  ;;  %s3157_s0 = smov 0   ;;  %s3159_s30 = smov 0  }
  0x19   :  { %s3161_s20 = smov 0   ;;  %s3163_s21 = smov 0  }
  0x1a LB: > { %3805 = sst [smem:[#allocation24_spill]] %s3023_s0  ;;  %s3037_s1 = smov [#allocation8]   ;;  %s3035_s21 = sphi %s3163_s21, %s3857_s21   ;;  %s3031_s20 = sphi %s3161_s20, %s3861_s20   ;;  %s3027_s30 = sphi %s3159_s30, %s3860_s30   ;;  %s3023_s0 = sphi %s3157_s0, %s3859_s0  }
  0x1b   : > { %3806 = sst [smem:[#allocation25_spill]] %s3035_s21  ;;  %s498_s22 = sshll.u32 %s3037_s1, 4  ;;  %s3183_s22 = int_to_ptr.vmem [resolvable:$true] %s498_s22 }
  0x1c   : > { %s3178_s2 = sadd.s32 4294967295, %s3035_s21   ;;  %p2164_p0 = scmp.ge.s32.totalorder %s3035_s21, 1 }
  0x1d   : > { %p3774_p1 = scmp.eq.s32.totalorder %s3178_s2, 0  ;;  %p486_p2 = scmp.lt.s32.totalorder %s3035_s21, 3 }
  0x1e   : > { %s3038_s24 = smov [#allocation11]   ;;  %s3039_s26 = smov [#allocation14]  }
  0x1f   : > { %p3185_p3 = pnand %p2164_p0, %p486_p2  ;;  %s530_s25 = sshll.u32 %s3038_s24, 4  ;;  %s3198_s25 = int_to_ptr.vmem [resolvable:$true] %s530_s25 }
  0x20   : > { %s568_s27 = sshll.u32 %s3039_s26, 4  ;;  %s3809_s1 = sld [smem:[#allocation33_spill]]  ;;  %s3200_s27 = int_to_ptr.vmem [resolvable:$true] %s568_s27 }
  0x21   : > { %s3807_s23 = scalar_select %p3185_p3, 1, 0 }
  0x22   : > { %p2532_p5 = pneg %p3185_p3 }
  0x24   : > { %p3194_p6 = pnand %p2532_p5, %p3774_p1 }
  0x26   : > { %s3808_s3 = scalar_select %p3194_p6, 1, 0 }
  0x27   : > { %s2695_s19 = scalar_lea.hbm %s3809_s1, 1024  ;;  %p3210_p8 = pneg %p3194_p6 }
  0x28   : > { %p2696_p7 = scmp.ne.s32.totalorder %s3809_s1, %s2695_s19  ;;  %p2702_p11 = scmp.lt.u32.totalorder %s2695_s19, %s3809_s1 }
  0x29   : > { %s3810_s24 = scalar_select %p3210_p8, 1, 0 }
  0x2a   : > { %p2698_p9 = pnand %p3210_p8, %p2696_p7 }
  0x2c   : > { %p2699_p10 = pneg %p2698_p9 }
  0x2e   : > { %p2704_p12 = pnand %p2702_p11, %p2699_p10 }
  0x30   : > { %2707 = shalt.err (!%p2704_p12)
}
  0x31   : > { %s2708_s17 = scalar_lea.vmem %s3183_s22, 1024  ;;  %p2716_p5 = scmp.lt.s32.totalorder %s3183_s22, %s3183_s22 }
  0x32   : > { %p2709_p13 = scmp.ne.s32.totalorder %s3183_s22, %s2708_s17  ;;  %p2717_p4 = scmp.lt.s32.totalorder %s2708_s17, %s2708_s17 }
  0x34   : > { %p2711_p0 = pnand %p2709_p13, %p3210_p8  ;;  %p2718_p7 = por %p2717_p4, %p2716_p5 }
  0x36   : > { %p2712_p2 = pneg %p2711_p0 }
  0x38   : > { %p2719_p9 = pnand %p2718_p7, %p2712_p2 }
  0x3a   : > { %2722 = shalt.err (!%p2719_p9)
}
  0x3b   : > { %s3765_s18 = smov 64   ;;  %s3767_s16 = smov 4  }
  0x3c   : > { %2535 = dma.hbm_to_vmem [thread:$0]  (!%p3194_p6), %s3809_s1, 1024, %s3183_s22, [#allocation9], %s3765_s18, %s3765_s18, %s3767_s16  }
  0x3d   : > { %s3811_s7 = sld [smem:[#allocation35_spill]] }
  0x43   : > { %s2723_s17 = scalar_lea.hbm %s3811_s7, 1024 }
  0x44   : > { %p2724_p4 = scmp.ne.s32.totalorder %s3811_s7, %s2723_s17  ;;  %p2730_p12 = scmp.lt.u32.totalorder %s2723_s17, %s3811_s7 }
  0x46   : > { %p2726_p10 = pnand %p2724_p4, %p3210_p8 }
  0x48   : > { %p2727_p11 = pneg %p2726_p10 }
  0x4a   : > { %p2732_p13 = pnand %p2730_p12, %p2727_p11 }
  0x4c   : > { %2735 = shalt.err (!%p2732_p13)
}
  0x4d   : > { %s2736_s22 = scalar_lea.vmem %s3198_s25, 1024  ;;  %p2744_p7 = scmp.lt.s32.totalorder %s3198_s25, %s3198_s25 }
  0x4e   : > { %p2737_p0 = scmp.ne.s32.totalorder %s3198_s25, %s2736_s22  ;;  %p2745_p9 = scmp.lt.s32.totalorder %s2736_s22, %s2736_s22 }
  0x50   : > { %p2739_p2 = pnand %p2737_p0, %p3210_p8  ;;  %p2746_p4 = por %p2745_p9, %p2744_p7 }
  0x52   : > { %p2740_p5 = pneg %p2739_p2 }
  0x54   : > { %p2747_p10 = pnand %p2746_p4, %p2740_p5 }
  0x56   : > { %2750 = shalt.err (!%p2747_p10)
}
  0x57   : > { %2541 = dma.hbm_to_vmem [thread:$0]  (!%p3194_p6), %s3811_s7, 1024, %s3198_s25, [#allocation12], %s3765_s18, %s3765_s18, %s3767_s16  }
  0x58   : > { %s3812_s13 = sld [smem:[#allocation39_spill]] }
  0x5e   : > { %s2751_s19 = scalar_lea.hbm %s3812_s13, 1024 }
  0x5f   : > { %p2752_p11 = scmp.ne.s32.totalorder %s3812_s13, %s2751_s19  ;;  %p2758_p0 = scmp.lt.u32.totalorder %s2751_s19, %s3812_s13 }
  0x61   : > { %p2754_p12 = pnand %p2752_p11, %p3210_p8 }
  0x63   : > { %p2755_p13 = pneg %p2754_p12 }
  0x65   : > { %p2760_p2 = pnand %p2758_p0, %p2755_p13 }
  0x67   : > { %2763 = shalt.err (!%p2760_p2)
}
  0x68   : > { %s2764_s25 = scalar_lea.vmem %s3200_s27, 1024  ;;  %p2772_p4 = scmp.lt.s32.totalorder %s3200_s27, %s3200_s27 }
  0x69   : > { %p2765_p5 = scmp.ne.s32.totalorder %s3200_s27, %s2764_s25  ;;  %p2773_p10 = scmp.lt.s32.totalorder %s2764_s25, %s2764_s25 }
  0x6b   : > { %p2767_p7 = pnand %p2765_p5, %p3210_p8  ;;  %p2774_p11 = por %p2773_p10, %p2772_p4 }
  0x6d   : > { %p2768_p9 = pneg %p2767_p7 }
  0x6f   : > { %p2775_p12 = pnand %p2774_p11, %p2768_p9 }
  0x71   : > { %2778 = shalt.err (!%p2775_p12)
}
  0x72   : > { %2547 = dma.hbm_to_vmem [thread:$0]  (!%p3194_p6), %s3812_s13, 1024, %s3200_s27, [#allocation15], %s3765_s18, %s3765_s18, %s3767_s16  }
  0x73   : > { %s2163_s11 = sadd.s32 4294967294, %s3035_s21   ;;  %s3288_s12 = sadd.s32 1, %s3035_s21  }
  0x74   : > { %3813 = sst [smem:[#allocation26_spill]] %s3288_s12  ;;  %s48_s14 = sadd.s32 1, %s3031_s20 }
  0x75   : > { %s45_s19 = ssub.s32 %s3035_s21, %s3288_s12  ;;  %p55_p13 = scmp.ne.s32.totalorder %s3031_s20, %s3027_s30 }
  0x76   : > { %p46_p0 = scmp.eq.s32.totalorder %s45_s19, 0  ;;  %p56_p2 = scmp.eq.s32.totalorder %s3035_s21, 0 }
  0x77   : > { %p61_p5 = scmp.ne.s32.totalorder %s3027_s30, %s3023_s0  ;;  %p473_p7 = scmp.eq.s32.totalorder %s3178_s2, 1 }
  0x78   : > { %s3300_s28 = scalar_select %p46_p0, %s3031_s20, %s48_s14  }
  0x79   : > { %p57_p9 = por %p56_p2, %p55_p13  ;;  %p3304_p4 = por %p3774_p1, %p61_p5 }
  0x7a   : > { %3814 = sst [smem:[#allocation27_spill]] %s3300_s28  ;;  %p3308_p10 = por %p473_p7, %p55_p13 }
  0x7b   : > { %s3815_s27 = scalar_select %p3304_p4, 1, 0 }
  0x7c   : > { %s3816_s29 = scalar_select %p3308_p10, 1, 0 }
  0x7d   : > { %p479_p11 = scmp.eq.s32.totalorder %s2163_s11, 1  ;;  %p2571_p12 = scmp.lt.s32.totalorder %s3035_s21, 2 }
  0x7e   : > { %3817 = sst [smem:[#allocation28_spill]] %s3816_s29  ;;  %s3769_s26 = sand.u32 1, %s3031_s20  }
  0x7f   : > { %p3314_p3 = por %p479_p11, %p61_p5  ;;  %s3320_s25 = sshll.u32 %s3769_s26, 3 }
  0x80   : > { %s3323_s22 = sshll.u32 %s3035_s21, 7  ;;  %p3325_p0 = pnand %p2571_p12, %p57_p9 }
  0x81   : > { %s3818_s17 = scalar_select %p3314_p3, 1, 0 }
  0x82   : > { %s3820_s10 = scalar_select %p3325_p0, 1, 0 }
  0x83   : > { %3819 = sst [smem:[#allocation29_spill]] %s3818_s17  ;;  %s625_s14 = sand.u32 1, %s3035_s21  }
  0x84   : > { %s3821_s18 = sld [smem:[#allocation31_spill]]  ;;  %s629_s26 = scalar_lea.vmem [#allocation5], %s3320_s25 }
  0x85   : > { %s636_s1 = sshll.u32 %s629_s26, 4  ;;  %s3339_s7 = scalar_lea.sflag [#allocation6], %s625_s14  ;;  %s3337_s1 = int_to_ptr.vmem [resolvable:$true] %s636_s1 }
  0x86   : > { %p3345_p2 = pneg %p3325_p0 }
  0x88   : > { %s3822_s28 = scalar_select %p3345_p2, 1, 0 }
  0x8a   : > { %s3334_s16 = scalar_lea.hbm %s3821_s18, %s3323_s22  ;;  %s2784_s12 = scalar_lea.hbm %s3821_s18, 256 }
  0x8b   : > { %s2779_s13 = scalar_lea.hbm %s3334_s16, 128  ;;  %p2785_p9 = scmp.lt.u32.totalorder %s3334_s16, %s3821_s18 }
  0x8c   : > { %p2780_p13 = scmp.ne.s32.totalorder %s3334_s16, %s2779_s13  ;;  %p2786_p11 = scmp.lt.u32.totalorder %s2784_s12, %s2779_s13 }
  0x8d   : > { %p2788_p1 = scmp.lt.u32.totalorder %s2779_s13, %s3334_s16 }
  0x8e   : > { %p2782_p5 = pnand %p3345_p2, %p2780_p13  ;;  %p2787_p12 = por %p2786_p11, %p2785_p9 }
  0x90   : > { %p2783_p7 = pneg %p2782_p5  ;;  %p2789_p3 = por %p2788_p1, %p2787_p12 }
  0x92   : > { %p2790_p10 = pnand %p2789_p3, %p2783_p7 }
  0x94   : > { %2793 = shalt.err (!%p2790_p10)
}
  0x95   : > { %s2794_s14 = scalar_lea.vmem %s3337_s1, 128  ;;  %s3042_s11 = smov [#allocation5]  }
  0x96   : > { %p2795_p13 = scmp.ne.s32.totalorder %s3337_s1, %s2794_s14  ;;  %s2799_s19 = sshll.u32 %s3042_s11, 4  ;;  %s2800_s19 = int_to_ptr.vmem [resolvable:$false] %s2799_s19 }
  0x97   : > { %s2801_s21 = scalar_lea.vmem %s2800_s19, 256  ;;  %p2802_p6 = scmp.lt.s32.totalorder %s3337_s1, %s2800_s19 }
  0x98   : > { %p2797_p5 = pnand %p2795_p13, %p3345_p2  ;;  %p2803_p8 = scmp.lt.s32.totalorder %s2801_s21, %s2794_s14 }
  0x9a   : > { %p2798_p4 = pneg %p2797_p5  ;;  %p2804_p9 = por %p2803_p8, %p2802_p6 }
  0x9c   : > { %p2805_p11 = pnand %p2804_p9, %p2798_p4 }
  0x9e   : > { %2808 = shalt.err (!%p2805_p11)
}
  0x9f   : > { %2557 = dma.hbm_to_vmem [thread:$0]  (!%p3325_p0), %s3334_s16, 128, %s3337_s1, %s3339_s7  }
  0xa0   : > { %s3043_s13 = smov [#allocation10]   ;;  %s3044_s26 = smov [#allocation13]  }
  0xa1   : > { %s514_s12 = sshll.u32 %s3043_s13, 4  ;;  %s546_s18 = sshll.u32 %s3044_s26, 4  ;;  %s515_s12 = int_to_ptr.vmem [resolvable:$true] %s514_s12  ;;  %s547_s18 = int_to_ptr.vmem [resolvable:$true] %s546_s18 }
  0xa2   : > { %s3823_s5 = sld [smem:[#allocation34_spill]]  ;;  %p3824_p3 = scmp.ne.s32.totalorder %s3810_s24, 0 }
  0xa8   : > { %s2809_s19 = scalar_lea.hbm %s3823_s5, 1024 }
  0xa9   : > { %p2810_p1 = scmp.ne.s32.totalorder %s3823_s5, %s2809_s19  ;;  %p2816_p4 = scmp.lt.u32.totalorder %s2809_s19, %s3823_s5 }
  0xab   : > { %p2812_p6 = pnand %p2810_p1, %p3824_p3 }
  0xad   : > { %p2813_p8 = pneg %p2812_p6 }
  0xaf   : > { %p2818_p10 = pnand %p2816_p4, %p2813_p8 }
  0xb1   : > { %2821 = shalt.err (!%p2818_p10)
}
  0xb2   : > { %s2822_s1 = scalar_lea.vmem %s515_s12, 1024  ;;  %p2830_p5 = scmp.lt.s32.totalorder %s515_s12, %s515_s12 }
  0xb3   : > { %p2823_p7 = scmp.ne.s32.totalorder %s515_s12, %s2822_s1  ;;  %p2831_p9 = scmp.lt.s32.totalorder %s2822_s1, %s2822_s1 }
  0xb5   : > { %p2825_p12 = pnand %p2823_p7, %p3824_p3  ;;  %p2832_p11 = por %p2831_p9, %p2830_p5 }
  0xb7   : > { %p2826_p13 = pneg %p2825_p12 }
  0xb9   : > { %p2833_p0 = pnand %p2832_p11, %p2826_p13 }
  0xbb   : > { %2836 = shalt.err (!%p2833_p0)
}
  0xbc   : > { %p3825_p1 = scmp.ne.s32.totalorder %s3808_s3, 0  ;;  %s3826_s16 = smov 4  }
  0xbd   : > { %s3827_s17 = smov 64   ;;  %s2837_s11 = scalar_lea.hbm %s3748_s9, 1024 }
  0xbe   : > { %2538 = dma.hbm_to_vmem [thread:$0]  (!%p3825_p1), %s3823_s5, 1024, %s515_s12, [#allocation9], %s3827_s17, %s3827_s17, %s3826_s16  }
  0xbf   : > { %p2838_p6 = scmp.ne.s32.totalorder %s3748_s9, %s2837_s11  ;;  %p2844_p4 = scmp.lt.u32.totalorder %s2837_s11, %s3748_s9 }
  0xc1   : > { %p2840_p0 = pnand %p2838_p6, %p3824_p3 }
  0xc3   : > { %p2841_p8 = pneg %p2840_p0 }
  0xc5   : > { %p2846_p10 = pnand %p2844_p4, %p2841_p8 }
  0xc7   : > { %2849 = shalt.err (!%p2846_p10)
}
  0xc8   : > { %s2850_s0 = scalar_lea.vmem %s547_s18, 1024  ;;  %p2858_p5 = scmp.lt.s32.totalorder %s547_s18, %s547_s18 }
  0xc9   : > { %p2851_p7 = scmp.ne.s32.totalorder %s547_s18, %s2850_s0  ;;  %p2859_p9 = scmp.lt.s32.totalorder %s2850_s0, %s2850_s0 }
  0xcb   : > { %p2853_p12 = pnand %p2851_p7, %p3824_p3  ;;  %p2860_p11 = por %p2859_p9, %p2858_p5 }
  0xcd   : > { %p2854_p13 = pneg %p2853_p12 }
  0xcf   : > { %p2861_p2 = pnand %p2860_p11, %p2854_p13 }
  0xd1   : > { %2864 = shalt.err (!%p2861_p2)
}
  0xd2   : > { %2544 = dma.hbm_to_vmem [thread:$0]  (!%p3825_p1), %s3748_s9, 1024, %s547_s18, [#allocation12], %s3827_s17, %s3827_s17, %s3826_s16  }
  0xd3   : > { %s3045_s13 = smov [#allocation16]   ;;  %s2865_s14 = scalar_lea.hbm %s3754_s15, 1024 }
  0xd4   : > { %s584_s26 = sshll.u32 %s3045_s13, 4  ;;  %p2866_p2 = scmp.ne.s32.totalorder %s3754_s15, %s2865_s14  ;;  %s585_s26 = int_to_ptr.vmem [resolvable:$true] %s584_s26 }
  0xd5   : > { %p2872_p8 = scmp.lt.u32.totalorder %s2865_s14, %s3754_s15 }
  0xd6   : > { %p2868_p6 = pnand %p2866_p2, %p3824_p3 }
  0xd8   : > { %p2869_p0 = pneg %p2868_p6 }
  0xda   : > { %p2874_p4 = pnand %p2872_p8, %p2869_p0 }
  0xdc   : > { %2877 = shalt.err (!%p2874_p4)
}
  0xdd   : > { %s2878_s18 = scalar_lea.vmem %s585_s26, 1024  ;;  %p2886_p13 = scmp.lt.s32.totalorder %s585_s26, %s585_s26 }
  0xde   : > { %p2879_p10 = scmp.ne.s32.totalorder %s585_s26, %s2878_s18  ;;  %p2887_p5 = scmp.lt.s32.totalorder %s2878_s18, %s2878_s18 }
  0xe0   : > { %p2881_p7 = pnand %p2879_p10, %p3824_p3  ;;  %p2888_p9 = por %p2887_p5, %p2886_p13 }
  0xe2   : > { %p2882_p12 = pneg %p2881_p7 }
  0xe4   : > { %p2889_p11 = pnand %p2888_p9, %p2882_p12 }
  0xe6   : > { %2892 = shalt.err (!%p2889_p11)
}
  0xe7   : > { %2550 = dma.hbm_to_vmem [thread:$0]  (!%p3825_p1), %s3754_s15, 1024, %s585_s26, [#allocation15], %s3827_s17, %s3827_s17, %s3826_s16  }
  0xe8   : > { %s3828_s13 = sld [smem:[#allocation30_spill]]  ;;  %s611_s3 = scalar_lea.vmem [#allocation2], %s3320_s25 }
  0xe9   : > { %s618_s19 = sshll.u32 %s611_s3, 4  ;;  %s3829_s14 = sand.u32 1, %s3031_s20   ;;  %s619_s19 = int_to_ptr.vmem [resolvable:$true] %s618_s19 }
  0xea   : > { %s608_s21 = scalar_lea.sflag [#allocation3], %s3829_s14  ;;  %p3830_p2 = scmp.ne.s32.totalorder %s3822_s28, 0 }
  0xee   : > { %s3436_s11 = scalar_lea.hbm %s3828_s13, %s3323_s22  ;;  %s2898_s26 = scalar_lea.hbm %s3828_s13, 256 }
  0xef   : > { %s2893_s1 = scalar_lea.hbm %s3436_s11, 128  ;;  %p2899_p1 = scmp.lt.u32.totalorder %s3436_s11, %s3828_s13 }
  0xf0   : > { %p2894_p3 = scmp.ne.s32.totalorder %s3436_s11, %s2893_s1  ;;  %p2900_p8 = scmp.lt.u32.totalorder %s2898_s26, %s2893_s1 }
  0xf1   : > { %p2902_p10 = scmp.lt.u32.totalorder %s2893_s1, %s3436_s11 }
  0xf2   : > { %p2896_p6 = pnand %p2894_p3, %p3830_p2  ;;  %p2901_p4 = por %p2900_p8, %p2899_p1 }
  0xf4   : > { %p2897_p0 = pneg %p2896_p6  ;;  %p2903_p7 = por %p2902_p10, %p2901_p4 }
  0xf6   : > { %p2904_p12 = pnand %p2903_p7, %p2897_p0 }
  0xf8   : > { %2907 = shalt.err (!%p2904_p12)
}
  0xf9   : > { %s2908_s5 = scalar_lea.vmem %s619_s19, 128  ;;  %s3046_s12 = smov [#allocation2]  }
  0xfa   : > { %p2909_p13 = scmp.ne.s32.totalorder %s619_s19, %s2908_s5  ;;  %s2913_s24 = sshll.u32 %s3046_s12, 4  ;;  %s2914_s24 = int_to_ptr.vmem [resolvable:$false] %s2913_s24 }
  0xfb   : > { %s2915_s29 = scalar_lea.vmem %s2914_s24, 256  ;;  %p2916_p11 = scmp.lt.s32.totalorder %s619_s19, %s2914_s24 }
  0xfc   : > { %p2911_p5 = pnand %p2909_p13, %p3830_p2  ;;  %p2917_p3 = scmp.lt.s32.totalorder %s2915_s29, %s2908_s5 }
  0xfe   : > { %p2912_p9 = pneg %p2911_p5  ;;  %p2918_p6 = por %p2917_p3, %p2916_p11 }
 0x100   : > { %p2919_p1 = pnand %p2918_p6, %p2912_p9 }
 0x102   : > { %2922 = shalt.err (!%p2919_p1)
}
 0x103   : > { %p3831_p8 = scmp.ne.s32.totalorder %s3820_s10, 0  ;;  %s3832_s1 = sld [smem:[#allocation32_spill]] }
 0x104   : > { %s647_s17 = scalar_lea.vmem [#allocation7], %s3320_s25 }
 0x105   : > { %2554 = dma.hbm_to_vmem [thread:$0]  (!%p3831_p8), %s3436_s11, 128, %s619_s19, %s608_s21  }
 0x106   : > { %s654_s26 = sshll.u32 %s647_s17, 4  ;;  %s655_s26 = int_to_ptr.vmem [resolvable:$true] %s654_s26 }
 0x109   : > { %s3462_s16 = scalar_lea.hbm %s3832_s1, %s3323_s22  ;;  %s2928_s11 = scalar_lea.hbm %s3832_s1, 256 }
 0x10a   : > { %s2923_s0 = scalar_lea.hbm %s3462_s16, 128  ;;  %p2929_p7 = scmp.lt.u32.totalorder %s3462_s16, %s3832_s1 }
 0x10b   : > { %p2924_p0 = scmp.ne.s32.totalorder %s3462_s16, %s2923_s0  ;;  %p2930_p12 = scmp.lt.u32.totalorder %s2928_s11, %s2923_s0 }
 0x10c   : > { %p2932_p5 = scmp.lt.u32.totalorder %s2923_s0, %s3462_s16 }
 0x10d   : > { %p2926_p4 = pnand %p2924_p0, %p3830_p2  ;;  %p2931_p13 = por %p2930_p12, %p2929_p7 }
 0x10f   : > { %p2927_p10 = pneg %p2926_p4  ;;  %p2933_p9 = por %p2932_p5, %p2931_p13 }
 0x111   : > { %p2934_p11 = pnand %p2933_p9, %p2927_p10 }
 0x113   : > { %2937 = shalt.err (!%p2934_p11)
}
 0x114   : > { %s2938_s25 = scalar_lea.vmem %s655_s26, 128  ;;  %s3047_s22 = smov [#allocation7]  }
 0x115   : > { %p2939_p3 = scmp.ne.s32.totalorder %s655_s26, %s2938_s25  ;;  %s2943_s12 = sshll.u32 %s3047_s22, 4  ;;  %s2944_s12 = int_to_ptr.vmem [resolvable:$false] %s2943_s12 }
 0x116   : > { %s2945_s24 = scalar_lea.vmem %s2944_s12, 256  ;;  %p2946_p0 = scmp.lt.s32.totalorder %s655_s26, %s2944_s12 }
 0x117   : > { %p2941_p6 = pnand %p2939_p3, %p3830_p2  ;;  %p2947_p4 = scmp.lt.s32.totalorder %s2945_s24, %s2938_s25 }
 0x119   : > { %p2942_p1 = pneg %p2941_p6  ;;  %p2948_p8 = por %p2947_p4, %p2946_p0 }
 0x11b   : > { %p2949_p7 = pnand %p2948_p8, %p2942_p1 }
 0x11d   : > { %2952 = shalt.err (!%p2949_p7)
}
 0x11e   : > { %p3833_p12 = scmp.ne.s32.totalorder %s3820_s10, 0  ;;  %p3834_p10 = scmp.ne.s32.totalorder %s3807_s23, 0 }
 0x11f   : > { %s3486_s28 = sand.u32 (!%p3834_p10), 1, %s3027_s30   ;;  %p3835_p2 = scmp.ne.s32.totalorder (!%p3834_p10), %s3815_s27, 0 }
 0x120   : > { %2560 = dma.hbm_to_vmem [thread:$0]  (!%p3833_p12), %s3462_s16, 128, %s655_s26, %s3339_s7  }
 0x121   : > { %663 = sbr.rel (%p3834_p10) target bundleno = 4073 (0xfe9), region = 96  ;;  %s3489_s29 = sshll.u32 (!%p3834_p10), %s3486_s28, 3 }
 0x122   : > { %s666_s3 = scalar_lea.sflag (!%p3834_p10), [#allocation3], %s3486_s28  ;;  %s669_s14 = scalar_lea.vmem (!%p3834_p10), [#allocation2], %s3489_s29 }
 0x128   : > { %2998 = dma.done.wait (%p3835_p2), %s666_s3, 128  }
 0x129   : > { %3000 = vsyncadd (%p3835_p2), %s666_s3, 4294967168  ;;  %s674_s7 = sand.u32 1, %s3178_s2   ;;  %s678_s10 = scalar_lea.vmem [#allocation5], %s3489_s29 }
 0x12a   : > { %s675_s23 = scalar_lea.sflag [#allocation6], %s674_s7 }
 0x12b   : > { %3002 = dma.done.wait (%p3835_p2), %s675_s23, 256  }
 0x12c   : > { %3004 = vsyncadd (%p3835_p2), %s675_s23, 4294967040  ;;  %s687_s16 = scalar_lea.vmem [#allocation7], %s3489_s29  ;;  %p3836_p8 = scmp.eq.s32.totalorder %s3178_s2, 0 }
 0x12e   : > { %3006 = dma.done.wait (%p3836_p8), [#allocation9], 2048   ;;  %p3837_p13 = pmov %p3836_p8 }
 0x12f   : > { %p3838_p5 = pmov %p3836_p8 }
 0x130   : > { %3008 = vsyncadd (%p3837_p13), [#allocation9], 4294965248 }
 0x131   : > { %3010 = dma.done.wait (%p3838_p5), [#allocation12], 2048   ;;  %p3839_p9 = pmov %p3838_p5 }
 0x132   : > { %p3840_p11 = pmov %p3838_p5 }
 0x133   : > { %3012 = vsyncadd (%p3839_p9), [#allocation12], 4294965248 }
 0x134   : > { %3014 = dma.done.wait (%p3840_p11), [#allocation15], 2048   ;;  %p3841_p3 = pmov %p3838_p5 }
 0x135   : > { %v3048_v0 = vmov 0.0   ;;  %vm3049_vm0 = vmmov 0   ;;  %v2627_v1 = vld [vmem:[#allocation10] sm:$0xff]   ;;  %v2629_v3 = vld [vmem:[#allocation10 + $0x8] sm:$0xff]   ;;  %v2631_v5 = vld [vmem:[#allocation10 + $0x10] sm:$0xff]   ;;  %vm1119_vm1 = vcmask 64512  }
 0x136   : > { %3016 = vsyncadd (%p3841_p3), [#allocation15], 4294965248  ;;  %2352 = vmatprep.subr.bf16.mxu1 %v3048_v0  ;;  %2332 = vmatprep.subr.bf16.mxu0 %v3048_v0  ;;  %v2628_v2 = vld [vmem:[#allocation8] sm:$0xff]   ;;  %v2630_v4 = vld [vmem:[#allocation8 + $0x8] sm:$0xff]   ;;  %s3050_s18 = smov 120   ;;  %vm1182_vm2 = vcmask 1043456  }
 0x137   : > { %2368 = vmatprep.mubr.msk.bf16.mxu1 %vm3049_vm0, %v3048_v0  ;;  %2348 = vmatprep.mubr.msk.bf16.mxu0 %vm3049_vm0, %v3048_v0  ;;  %v2632_v6 = vld [vmem:[#allocation8 + $0x10] sm:$0xff]   ;;  %v2633_v7 = vld [vmem:[#allocation10 + $0x18] sm:$0xff]   ;;  %v2635_v9 = vld [vmem:[#allocation10 + $0x20] sm:$0xff]   ;;  %s3051_s19 = smov 112   ;;  %s3052_s21 = smov 104   ;;  %vm1575_vm3 = vcmask 130048  }
 0x138   : > { %2353 = vmatpush3.bf16.xpose.msra.mxu1 %v2627_v1  ;;  %2333 = vmatpush3.bf16.xpose.msra.mxu0 %v2628_v2  ;;  %v2634_v8 = vld [vmem:[#allocation8 + $0x18] sm:$0xff]   ;;  %v2636_v10 = vld [vmem:[#allocation8 + $0x20] sm:$0xff]   ;;  %v2637_v11 = vld [vmem:[#allocation10 + $0x28] sm:$0xff]   ;;  %s3053_s25 = smov 8   ;;  %s3054_s22 = smov 16   ;;  %vm1577_vm4 = vcmask 195584  }
 0x139   : > { %2354 = vmatprep.subr.bf16.mxu1 %v3048_v0  ;;  %2334 = vmatprep.subr.bf16.mxu0 %v3048_v0  ;;  %v2638_v12 = vld [vmem:[#allocation8 + $0x28] sm:$0xff]   ;;  %v2639_v13 = vld [vmem:[#allocation10 + $0x30] sm:$0xff]   ;;  %v2641_v15 = vld [vmem:[#allocation10 + $0x38] sm:$0xff]   ;;  %s3055_s12 = smov 24   ;;  %vm1579_vm5 = vcmask 261120   ;;  %s3844_s17 = sld [smem:[#allocation38_spill]] }
 0x13a   : > { %v2640_v14 = vld [vmem:[#allocation8 + $0x30] sm:$0xff]   ;;  %v2642_v16 = vld [vmem:[#allocation8 + $0x38] sm:$0xff]   ;;  %v778_v17 = vld [vmem:[%s678_s10] sm:$0xff]  ;;  %s3843_s10 = sld [smem:[#allocation37_spill]]  ;;  %s2259_s7 = sshll.u32 %s3178_s2, 7 }
 0x13b   : > { %v3540_v18 = vld [vmem:[%s669_s14] sm:$0xff]  ;;  %v908_v19 = vpack.c.bf16 %v778_v17, %v778_v17  ;;  %v2643_v36 = vld [vmem:[#allocation11] sm:$0xff]   ;;  %v2644_v37 = vld [vmem:[#allocation11 + $0x8] sm:$0xff]   ;;  %s3842_s14 = sld [smem:[#allocation36_spill]]  ;;  %s775_s23 = scalar_lea.vmem [#allocation17], %s3489_s29 }
 0x13c   : > { %v796_v20 = vpack.c.bf16 %v3540_v18, %v3540_v18  ;;  %v2198_v21 = vld [vmem:[%s3745_s6] ss:$0 sm:$0xff]  ;;  %v2646_v39 = vld [vmem:[#allocation11 + $0x18] sm:$0xff]   ;;  %v2647_v40 = vld [vmem:[#allocation11 + $0x20] sm:$0xff]   ;;  %s1980_s0 = scalar_lea.sflag [#allocation4], %s3486_s28  ;;  %s3056_s2 = smov [#allocation17]  }
 0x13d   : > { %v2189_v22 = vld [vmem:[%s3743_s4] ss:$0 sm:$0xff]  ;;  %v2648_v41 = vld [vmem:[#allocation11 + $0x28] sm:$0xff]   ;;  %v2650_v43 = vld [vmem:[#allocation11 + $0x38] sm:$0xff]   ;;  %s2957_s29 = sshll.u32 %s3056_s2, 4  ;;  %s2958_s29 = int_to_ptr.vmem [resolvable:$false] %s2957_s29 }
 0x13e   : > { %v2645_v38 = vld [vmem:[#allocation11 + $0x10] sm:$0xff]   ;;  %vm2233_vm6 = vmpackc.low %vm1579_vm5, %vm1579_vm5  ;;  %s2959_s5 = scalar_lea.vmem %s2958_s29, 256 }
 0x13f   : > { %v2649_v42 = vld [vmem:[#allocation11 + $0x30] sm:$0xff]  }
 0x140   : > { %2355 = vmatpush3.bf16.xpose.msra.mxu1 %v2629_v3  ;;  %2335 = vmatpush3.bf16.xpose.msra.mxu0 %v2630_v4  ;;  %v779_v44 = vld [vmem:[%s687_s16] sm:$0xff] }
 0x141   : > { %2356 = vmatprep.subr.bf16.mxu1 %v3048_v0  ;;  %2336 = vmatprep.subr.bf16.mxu0 %v3048_v0  ;;  %v1020_v45 = vpack.c.bf16 %v779_v44, %v779_v44  ;;  %v2207_v61 = vld [vmem:[%s3747_s8] ss:$0 sm:$0xff] }
 0x148   : > { %2357 = vmatpush3.bf16.xpose.msra.mxu1 %v2631_v5  ;;  %2337 = vmatpush3.bf16.xpose.msra.mxu0 %v2632_v6 }
 0x149   : > { %2358 = vmatprep.subr.bf16.mxu1 %v3048_v0  ;;  %2338 = vmatprep.subr.bf16.mxu0 %v3048_v0 }
 0x150   : > { %2359 = vmatpush3.bf16.xpose.msra.mxu1 %v2633_v7  ;;  %2339 = vmatpush3.bf16.xpose.msra.mxu0 %v2634_v8 }
 0x151   : > { %2360 = vmatprep.subr.bf16.mxu1 %v3048_v0  ;;  %2340 = vmatprep.subr.bf16.mxu0 %v3048_v0 }
 0x158   : > { %2361 = vmatpush3.bf16.xpose.msra.mxu1 %v2635_v9  ;;  %2341 = vmatpush3.bf16.xpose.msra.mxu0 %v2636_v10 }
 0x159   : > { %2362 = vmatprep.subr.bf16.mxu1 %v3048_v0  ;;  %2342 = vmatprep.subr.bf16.mxu0 %v3048_v0 }
 0x160   : > { %2363 = vmatpush3.bf16.xpose.msra.mxu1 %v2637_v11  ;;  %2343 = vmatpush3.bf16.xpose.msra.mxu0 %v2638_v12 }
 0x161   : > { %2364 = vmatprep.subr.bf16.mxu1 %v3048_v0  ;;  %2344 = vmatprep.subr.bf16.mxu0 %v3048_v0 }
 0x168   : > { %2365 = vmatpush3.bf16.xpose.msra.mxu1 %v2639_v13  ;;  %2345 = vmatpush3.bf16.xpose.msra.mxu0 %v2640_v14 }
 0x169   : > { %2366 = vmatprep.subr.bf16.mxu1 %v3048_v0  ;;  %2346 = vmatprep.subr.bf16.mxu0 %v3048_v0 }
 0x170   : > { %2367 = vmatpush3.bf16.xpose.msra.mxu1 %v2641_v15  ;;  %2347 = vmatpush3.bf16.xpose.msra.mxu0 %v2642_v16 }
 0x171   : > { %2392 = vmatprep.subr.bf16.mxu1 %v3048_v0  ;;  %2372 = vmatprep.subr.bf16.mxu0 %v3048_v0 }
 0x177   : > { %2369 = vmatmul.mubr.bf16.vlgmr.msra.gmra.mrb[0].mxu1 %v908_v19  ;;  %2349 = vmatmul.mubr.bf16.vlgmr.msra.gmra.mrb[0].mxu0 %v796_v20 }
 0x178   : > { %2394 = vmatprep.mubr.msk.bf16.mxu1 %vm3049_vm0, %v3048_v0  ;;  %2388 = vmatprep.mubr.msk.bf16.mxu0 %vm3049_vm0, %v3048_v0 }
 0x179   : > { %2373 = vmatpush3.bf16.xpose.msra.mxu0 %v2643_v36 }
 0x17a   : > { %2374 = vmatprep.subr.bf16.mxu0 %v3048_v0 }
 0x181   : > { %2375 = vmatpush3.bf16.xpose.msra.mxu0 %v2644_v37 }
 0x182   : > { %2376 = vmatprep.subr.bf16.mxu0 %v3048_v0 }
 0x189   : > { %2377 = vmatpush3.bf16.xpose.msra.mxu0 %v2645_v38 }
 0x18a   : > { %2378 = vmatprep.subr.bf16.mxu0 %v3048_v0 }
 0x191   : > { %2379 = vmatpush3.bf16.xpose.msra.mxu0 %v2646_v39 }
 0x192   : > { %2380 = vmatprep.subr.bf16.mxu0 %v3048_v0 }
 0x199   : > { %2381 = vmatpush3.bf16.xpose.msra.mxu0 %v2647_v40 }
 0x19a   : > { %2382 = vmatprep.subr.bf16.mxu0 %v3048_v0 }
 0x1a1   : > { %2383 = vmatpush3.bf16.xpose.msra.mxu0 %v2648_v41 }
 0x1a2   : > { %2384 = vmatprep.subr.bf16.mxu0 %v3048_v0 }
 0x1a9   : > { %2385 = vmatpush3.bf16.xpose.msra.mxu0 %v2649_v42 }
 0x1aa   : > { %2386 = vmatprep.subr.bf16.mxu0 %v3048_v0 }
 0x1b1   : > { %2387 = vmatpush3.bf16.xpose.msra.mxu0 %v2650_v43 }
 0x1b2   : > { %2440 = vmatprep.subr.bf16.mxu0 %v3048_v0 }
 0x1b8   : > { %2389 = vmatmul.mubr.bf16.vlgmr.msra.gmra.mrb[4].mxu0 %v1020_v45 }
 0x1b9   : > { %2456 = vmatprep.mubr.msk.bf16.mxu0 %vm3049_vm0, %v3048_v0 }
 0x24a   : > { %v998_v23 = vpop.f32.mrb[0].mxu1  ;;  %v886_v26 = vpop.f32.mrb[0].mxu0 }
 0x24b   : > { %v999_v24 = vadd.f32 %v2198_v21, %v998_v23  ;;  %v2370_v25 = vpop.f32.mrb[1].mxu1  ;;  %v887_v28 = vadd.f32 %v2189_v22, %v886_v26  ;;  %v2350_v29 = vpop.f32.mrb[1].mxu0 }
 0x24c   : > { %v1001_v27 = vpop.f32.mrb[2].mxu1  ;;  %v889_v32 = vpop.f32.mrb[2].mxu0 }
 0x24d   : > { %v3556_v30 = vpack.c.bf16 %v999_v24, %v999_v24  ;;  %v2371_v31 = vpop.f32.mrb[3].mxu1  ;;  %v2351_v33 = vpop.f32.mrb[3].mxu0  ;;  %v3560_v34 = vpack.c.bf16 %v887_v28, %v887_v28 }
 0x24f   : > { %1230 = vrot.lane.b32.xlu1 %v3556_v30, %s3050_s18  ;;  %v1124_v35 = vsel %vm1119_vm1, %v3556_v30, 0 }
 0x250   : > { %2393 = vmatpush3.bf16.xpose.msra.mxu1 %v1124_v35 }
 0x251   : > { %2398 = vmatprep.subr.bf16.mxu1 %v3048_v0 }
 0x253   : > { %1227 = vrot.lane.b32.xlu1 %v3560_v34, %s3050_s18 }
 0x257   : > { %2395 = vmatmul.mubr.msk.bf16.vlgmr.msra.gmra.mrb[4].mxu1 %vm1119_vm1, %v3560_v34 }
 0x258   : > { %2400 = vmatprep.mubr.msk.bf16.mxu1 %vm3049_vm0, %v3048_v0 }
 0x28b   : > { %v1110_v55 = vpop.f32.mrb[4].mxu0 }
 0x28c   : > { %v2390_v56 = vpop.f32.mrb[5].mxu0  ;;  %v1111_v62 = vadd.f32 %v2207_v61, %v1110_v55 }
 0x28d   : > { %v1113_v57 = vpop.f32.mrb[6].mxu0 }
 0x28e   : > { %v2391_v58 = vpop.f32.mrb[7].mxu0  ;;  %v3588_v63 = vpack.c.bf16 %v1111_v62, %v1111_v62 }
 0x290   : > { %v1184_v1 = vsel %vm1182_vm2, %v3588_v63, 0 }
 0x291   : > { %2399 = vmatpush3.bf16.msra.mxu1 %v1184_v1 }
 0x292   : > { %2404 = vmatprep.subr.bf16.mxu1 %v3048_v0 }
 0x2c1   : > { %v1231_v5 = vpop.permute.xlu1 %1230 }
 0x2c2   : > { %v1236_v7 = vsel %vm1119_vm1, %v1231_v5, 0 }
 0x2c5   : > { %v1228_v8 = vpop.permute.xlu1 %1227 }
 0x32a   : > { %v1160_v46 = vpop.f32.mrb[4].mxu1 }
 0x32b   : > { %v1166_v47 = vmul.f32 0.35355338, %v1160_v46  ;;  %v2396_v48 = vpop.f32.mrb[5].mxu1 }
 0x32c   : > { %v1163_v49 = vpop.f32.mrb[6].mxu1 }
 0x32d   : > { %v2397_v50 = vpop.f32.mrb[7].mxu1  ;;  %v1167_v51 = vsel %vm1119_vm1, %v1166_v47, -inf }
 0x32e   : > { %1168 = vmax.xlane.f32.xlu0 %v1167_v51 }
 0x3bb   : > { %v1169_v52 = vpop.xlane.xlu0 %1168 }
 0x3bc   : > { %v1170_v53 = vsub.f32 %v1166_v47, %v1169_v52 }
 0x3be   : > { %v1171_v54 = vmul.f32 1.442695, %v1170_v53 }
 0x3c0   : > { %2675 = vpow2.f32 %v1171_v54 }
 0x3ca   : > { %v2676_v59 = vpop.eup %2675 }
 0x3cb   : > { %v1173_v60 = vsel %vm1119_vm1, %v2676_v59, 0.0 }
 0x3cc   : > { %1174 = vadd.xlane.f32.xlu0 %v1173_v60 }
 0x459   : > { %v1175_v2 = vpop.xlane.xlu0 %1174 }
 0x45a   : > { %2677 = vrcp.f32 %v1175_v2 }
 0x464   : > { %v2678_v3 = vpop.eup %2677 }
 0x465   : > { %v1177_v4 = vmul.f32 %v2678_v3, %v2676_v59 }
 0x467   : > { %v1178_v6 = vpack.c.bf16 %v1177_v4, %v1177_v4 }
 0x469   : > { %2401 = vmatmul.mubr.msk.bf16.vlgmr.msra.gmra.mrb[8].mxu1 %vm1119_vm1, %v1178_v6 }
 0x46a   : > { %2405 = vmatpush3.bf16.xpose.msra.mxu1 %v1236_v7  ;;  %2406 = vmatprep.mubr.msk.bf16.mxu1 %vm3049_vm0, %v3048_v0 }
 0x46b   : > { %2410 = vmatprep.subr.bf16.mxu1 %v3048_v0 }
 0x471   : > { %2407 = vmatmul.mubr.msk.bf16.vlgmr.msra.gmra.mrb[12].mxu1 %vm1119_vm1, %v1228_v8 }
 0x472   : > { %2412 = vmatprep.mubr.msk.bf16.mxu1 %vm3049_vm0, %v3048_v0 }
 0x53c   : > { %v3601_v9 = vpop.f32.mrb[8].mxu1 }
 0x53d   : > { %v2402_v10 = vpop.f32.mrb[9].mxu1 }
 0x53e   : > { %v1223_v11 = vpop.f32.mrb[10].mxu1 }
 0x53f   : > { %v2403_v12 = vpop.f32.mrb[11].mxu1 }
 0x544   : > { %v1272_v13 = vpop.f32.mrb[12].mxu1 }
 0x545   : > { %v1278_v14 = vmul.f32 0.35355338, %v1272_v13  ;;  %v2408_v15 = vpop.f32.mrb[13].mxu1 }
 0x546   : > { %v1275_v16 = vpop.f32.mrb[14].mxu1 }
 0x547   : > { %v2409_v17 = vpop.f32.mrb[15].mxu1  ;;  %v1279_v19 = vsel %vm1119_vm1, %v1278_v14, -inf }
 0x548   : > { %1280 = vmax.xlane.f32.xlu0 %v1279_v19  ;;  %v2651_v17 = vld [vmem:[#allocation13] sm:$0xff]   ;;  %v2652_v19 = vld [vmem:[#allocation13 + $0x8] sm:$0xff]  }
 0x549   : > { %2441 = vmatpush3.bf16.xpose.msra.mxu0 %v2651_v17 }
 0x54a   : > { %2442 = vmatprep.subr.bf16.mxu0 %v3048_v0 }
 0x551   : > { %2443 = vmatpush3.bf16.xpose.msra.mxu0 %v2652_v19 }
 0x552   : > { %2444 = vmatprep.subr.bf16.mxu0 %v3048_v0 }
 0x55e   : > { %1292 = vrot.lane.b32.xlu0 %v3588_v63, %s3050_s18  ;;  %s3845_s18 = sld [smem:[#allocation40_spill]] }
 0x562   : > { %1342 = vrot.lane.b32.xlu0 %v3556_v30, %s3051_s19 }
 0x566   : > { %1340 = vrot.lane.b32.xlu0 %v3560_v34, %s3051_s19 }
 0x5d5   : > { %v1281_v20 = vpop.xlane.xlu0 %1280 }
 0x5d6   : > { %v1282_v21 = vsub.f32 %v1278_v14, %v1281_v20  ;;  %v2653_v20 = vld [vmem:[#allocation13 + $0x10] sm:$0xff]  }
 0x5d7   : > { %2445 = vmatpush3.bf16.xpose.msra.mxu0 %v2653_v20 }
 0x5d8   : > { %v1283_v22 = vmul.f32 1.442695, %v1282_v21  ;;  %2446 = vmatprep.subr.bf16.mxu0 %v3048_v0  ;;  %v2654_v21 = vld [vmem:[#allocation13 + $0x18] sm:$0xff]  }
 0x5d9   : > { %v1293_v23 = vpop.permute.xlu0 %1292 }
 0x5da   : > { %2679 = vpow2.f32 %v1283_v22  ;;  %v1298_v24 = vsel %vm1182_vm2, %v1293_v23, 0  ;;  %v2655_v22 = vld [vmem:[#allocation13 + $0x20] sm:$0xff]   ;;  %v2656_v23 = vld [vmem:[#allocation13 + $0x28] sm:$0xff]  }
 0x5db   : > { %2411 = vmatpush3.bf16.msra.mxu1 %v1298_v24  ;;  %v2657_v24 = vld [vmem:[#allocation13 + $0x30] sm:$0xff]  }
 0x5dc   : > { %2416 = vmatprep.subr.bf16.mxu1 %v3048_v0 }
 0x5dd   : > { %v1343_v31 = vpop.permute.xlu0 %1342 }
 0x5de   : > { %v1348_v33 = vsel %vm1119_vm1, %v1343_v31, 0 }
 0x5df   : > { %2447 = vmatpush3.bf16.xpose.msra.mxu0 %v2654_v21 }
 0x5e0   : > { %2448 = vmatprep.subr.bf16.mxu0 %v3048_v0 }
 0x5e1   : > { %v1341_v36 = vpop.permute.xlu0 %1340 }
 0x5e4   : > { %v2680_v25 = vpop.eup %2679 }
 0x5e5   : > { %v1285_v26 = vsel %vm1119_vm1, %v2680_v25, 0.0 }
 0x5e6   : > { %1286 = vadd.xlane.f32.xlu1 %v1285_v26 }
 0x5e7   : > { %2449 = vmatpush3.bf16.xpose.msra.mxu0 %v2655_v22 }
 0x5e8   : > { %2450 = vmatprep.subr.bf16.mxu0 %v3048_v0 }
 0x5ef   : > { %2451 = vmatpush3.bf16.xpose.msra.mxu0 %v2656_v23 }
 0x5f0   : > { %2452 = vmatprep.subr.bf16.mxu0 %v3048_v0 }
 0x5f7   : > { %1403 = vrot.lane.b32.xlu1 %v3588_v63, %s3051_s19  ;;  %2453 = vmatpush3.bf16.xpose.msra.mxu0 %v2657_v24  ;;  %s3846_s19 = sld [smem:[#allocation41_spill]] }
 0x5f8   : > { %2454 = vmatprep.subr.bf16.mxu0 %v3048_v0 }
 0x5fd   : > { %v2247_v19 = vld [vmem:[%s3846_s19] ss:$0 sm:$0xff] }
 0x673   : > { %v1287_v27 = vpop.xlane.xlu1 %1286 }
 0x674   : > { %2681 = vrcp.f32 %v1287_v27 }
 0x677   : > { %v1404_v35 = vpop.permute.xlu1 %1403 }
 0x678   : > { %v1409_v37 = vsel %vm1182_vm2, %v1404_v35, 0 }
 0x67e   : > { %v2682_v28 = vpop.eup %2681 }
 0x67f   : > { %v1289_v29 = vmul.f32 %v2682_v28, %v2680_v25  ;;  %v2658_v25 = vld [vmem:[#allocation13 + $0x38] sm:$0xff]  }
 0x680   : > { %2455 = vmatpush3.bf16.xpose.msra.mxu0 %v2658_v25 }
 0x681   : > { %v1290_v32 = vpack.c.bf16 %v1289_v29, %v1289_v29  ;;  %2480 = vmatprep.subr.bf16.mxu0 %v3048_v0 }
 0x683   : > { %2413 = vmatmul.mubr.msk.bf16.vlgmr.msra.gmra.mrb[16].mxu1 %vm1119_vm1, %v1290_v32 }
 0x684   : > { %2417 = vmatpush3.bf16.xpose.msra.mxu1 %v1348_v33  ;;  %2418 = vmatprep.mubr.msk.bf16.mxu1 %vm3049_vm0, %v3048_v0 }
 0x685   : > { %2422 = vmatprep.subr.bf16.mxu1 %v3048_v0 }
 0x68b   : > { %2419 = vmatmul.mubr.msk.bf16.vlgmr.msra.gmra.mrb[20].mxu1 %vm1119_vm1, %v1341_v36 }
 0x68c   : > { %2423 = vmatpush3.bf16.msra.mxu1 %v1409_v37  ;;  %2424 = vmatprep.mubr.msk.bf16.mxu1 %vm3049_vm0, %v3048_v0 }
 0x68d   : > { %2428 = vmatprep.subr.bf16.mxu1 %v3048_v0 }
 0x756   : > { %v1334_v38 = vpop.f32.mrb[16].mxu1 }
 0x757   : > { %v2414_v39 = vpop.f32.mrb[17].mxu1 }
 0x758   : > { %v1337_v40 = vpop.f32.mrb[18].mxu1  ;;  %v2659_v39 = vld [vmem:[#allocation14] sm:$0xff]  }
 0x759   : > { %v2415_v41 = vpop.f32.mrb[19].mxu1  ;;  %v2660_v40 = vld [vmem:[#allocation14 + $0x8] sm:$0xff]  }
 0x75a   : > { %v2661_v41 = vld [vmem:[#allocation14 + $0x10] sm:$0xff]  }
 0x75e   : > { %v1384_v42 = vpop.f32.mrb[20].mxu1 }
 0x75f   : > { %v1390_v43 = vmul.f32 0.35355338, %v1384_v42  ;;  %v2420_v44 = vpop.f32.mrb[21].mxu1  ;;  %v2663_v42 = vld [vmem:[#allocation14 + $0x20] sm:$0xff]  }
 0x760   : > { %v1387_v45 = vpop.f32.mrb[22].mxu1 }
 0x761   : > { %v2421_v46 = vpop.f32.mrb[23].mxu1  ;;  %v1391_v47 = vsel %vm1119_vm1, %v1390_v43, -inf }
 0x762   : > { %1392 = vmax.xlane.f32.xlu0 %v1391_v47 }
 0x7ef   : > { %v1393_v48 = vpop.xlane.xlu0 %1392 }
 0x7f0   : > { %v1394_v49 = vsub.f32 %v1390_v43, %v1393_v48  ;;  %v2224_v43 = vld [vmem:[%s3842_s14] ss:$0 sm:$0xff]  ;;  %s3849_s14 = sld [smem:[#allocation43_spill]] }
 0x7f2   : > { %v1395_v50 = vmul.f32 1.442695, %v1394_v49 }
 0x7f4   : > { %2683 = vpow2.f32 %v1395_v50 }
 0x7fe   : > { %v2684_v51 = vpop.eup %2683 }
 0x7ff   : > { %v1397_v52 = vsel %vm1119_vm1, %v2684_v51, 0.0 }
 0x800   : > { %1398 = vadd.xlane.f32.xlu1 %v1397_v52  ;;  %v2665_v52 = vld [vmem:[#allocation14 + $0x30] sm:$0xff]  }
 0x811   : > { %1453 = vrot.lane.b32.xlu1 %v3556_v30, %s3052_s21 }
 0x815   : > { %1451 = vrot.lane.b32.xlu1 %v3560_v34, %s3052_s21 }
 0x88d   : > { %v1399_v53 = vpop.xlane.xlu1 %1398 }
 0x88e   : > { %2685 = vrcp.f32 %v1399_v53  ;;  %v2666_v53 = vld [vmem:[#allocation14 + $0x38] sm:$0xff]  }
 0x891   : > { %v1454_v56 = vpop.permute.xlu1 %1453 }
 0x892   : > { %v1459_v58 = vsel %vm1119_vm1, %v1454_v56, 0  ;;  %v2670_v56 = vld [vmem:[#allocation16 + $0x18] sm:$0xff]  }
 0x895   : > { %v1452_v59 = vpop.permute.xlu1 %1451 }
 0x898   : > { %v2686_v54 = vpop.eup %2685 }
 0x899   : > { %v1401_v55 = vmul.f32 %v2686_v54, %v2684_v51  ;;  %v2664_v51 = vld [vmem:[#allocation14 + $0x28] sm:$0xff]   ;;  %v2667_v54 = vld [vmem:[#allocation16] sm:$0xff]  }
 0x89b   : > { %v1402_v57 = vpack.c.bf16 %v1401_v55, %v1401_v55  ;;  %v2668_v55 = vld [vmem:[#allocation16 + $0x8] sm:$0xff]  }
 0x89d   : > { %2425 = vmatmul.mubr.msk.bf16.vlgmr.msra.gmra.mrb[24].mxu1 %vm1119_vm1, %v1402_v57  ;;  %v2671_v57 = vld [vmem:[#allocation16 + $0x20] sm:$0xff]  }
 0x89e   : > { %2429 = vmatpush3.bf16.xpose.msra.mxu1 %v1459_v58  ;;  %2430 = vmatprep.mubr.msk.bf16.mxu1 %vm3049_vm0, %v3048_v0  ;;  %v2672_v58 = vld [vmem:[#allocation16 + $0x28] sm:$0xff]  }
 0x89f   : > { %2434 = vmatprep.subr.bf16.mxu1 %v3048_v0 }
 0x8a5   : > { %2431 = vmatmul.mubr.msk.bf16.vlgmr.msra.gmra.mrb[28].mxu1 %vm1119_vm1, %v1452_v59  ;;  %v2673_v59 = vld [vmem:[#allocation16 + $0x30] sm:$0xff]  }
 0x8a6   : > { %2436 = vmatprep.mubr.msk.bf16.mxu1 %vm3049_vm0, %v3048_v0 }
 0x970   : > { %v1445_v30 = vpop.f32.mrb[24].mxu1 }
 0x971   : > { %v2426_v34 = vpop.f32.mrb[25].mxu1 }
 0x972   : > { %v1448_v60 = vpop.f32.mrb[26].mxu1 }
 0x973   : > { %v2427_v61 = vpop.f32.mrb[27].mxu1 }
 0x978   : > { %v1495_v62 = vpop.f32.mrb[28].mxu1 }
 0x979   : > { %v1501_v1 = vmul.f32 0.35355338, %v1495_v62  ;;  %v2432_v2 = vpop.f32.mrb[29].mxu1 }
 0x97a   : > { %v1498_v3 = vpop.f32.mrb[30].mxu1 }
 0x97b   : > { %v2433_v4 = vpop.f32.mrb[31].mxu1  ;;  %v1502_v5 = vsel %vm1119_vm1, %v1501_v1, -inf }
 0x97c   : > { %1503 = vmax.xlane.f32.xlu0 %v1502_v5 }
 0x992   : > { %1514 = vrot.lane.b32.xlu0 %v3588_v63, %s3052_s21  ;;  %s3847_s21 = sld [smem:[#allocation28_spill]] }
 0x996   : > { %1563 = vrot.lane.b32.xlu0 %v1334_v38, %s3053_s25 }
 0x998   : > { %p3851_p1 = scmp.ne.s32.totalorder %s3847_s21, 0 }
 0x99a   : > { %1567 = vrot.lane.b32.xlu0 %v1445_v30, %s3054_s22  ;;  %v2674_v30 = vld [vmem:[#allocation16 + $0x38] sm:$0xff]  }
 0xa09   : > { %v1504_v6 = vpop.xlane.xlu0 %1503 }
 0xa0a   : > { %v1505_v7 = vsub.f32 %v1501_v1, %v1504_v6  ;;  %v2236_v6 = vld [vmem:[%s3843_s10] ss:$0 sm:$0xff]  ;;  %s1993_s10 = sshll.u32 %s775_s23, 4  ;;  %s3697_s10 = int_to_ptr.vmem [resolvable:$true] %s1993_s10 }
 0xa0b   : > { %p2960_p7 = scmp.lt.s32.totalorder %s3697_s10, %s2958_s29 }
 0xa0c   : > { %v1506_v8 = vmul.f32 1.442695, %v1505_v7 }
 0xa0d   : > { %v1515_v10 = vpop.permute.xlu0 %1514 }
 0xa0e   : > { %2687 = vpow2.f32 %v1506_v8  ;;  %v1520_v11 = vsel %vm1182_vm2, %v1515_v10, 0 }
 0xa0f   : > { %2435 = vmatpush3.bf16.msra.mxu1 %v1520_v11 }
 0xa10   : > { %2460 = vmatprep.subr.bf16.mxu1 %v3048_v0 }
 0xa11   : > { %v1564_v31 = vpop.permute.xlu0 %1563 }
 0xa12   : > { %v1574_v33 = vsel %vm1119_vm1, %v3601_v9, %v1564_v31  ;;  %v2662_v9 = vld [vmem:[#allocation14 + $0x18] sm:$0xff]  }
 0xa15   : > { %v1568_v32 = vpop.permute.xlu0 %1567 }
 0xa16   : > { %v1576_v35 = vsel %vm1575_vm3, %v1574_v33, %v1568_v32 }
 0xa18   : > { %v2688_v12 = vpop.eup %2687 }
 0xa19   : > { %v1508_v13 = vsel %vm1119_vm1, %v2688_v12, 0.0 }
 0xa1a   : > { %1509 = vadd.xlane.f32.xlu1 %v1508_v13 }
 0xaa7   : > { %v1510_v14 = vpop.xlane.xlu1 %1509 }
 0xaa8   : > { %2689 = vrcp.f32 %v1510_v14 }
 0xab2   : > { %v2690_v63 = vpop.eup %2689 }
 0xab3   : > { %v1512_v15 = vmul.f32 %v2690_v63, %v2688_v12  ;;  %v2238_v12 = vld [vmem:[%s3845_s18] ss:$0 sm:$0xff]  ;;  %s2953_s18 = scalar_lea.vmem %s3697_s10, 128 }
 0xab4   : > { %p2954_p6 = scmp.ne.s32.totalorder %s3697_s10, %s2953_s18  ;;  %p2961_p12 = scmp.lt.s32.totalorder %s2959_s5, %s2953_s18 }
 0xab5   : > { %v1513_v16 = vpack.c.bf16 %v1512_v15, %v1512_v15 }
 0xab6   : > { %p2955_p0 = pnand %p2954_p6, %p3851_p1  ;;  %p2962_p10 = por %p2961_p12, %p2960_p7 }
 0xab7   : > { %2437 = vmatmul.mubr.msk.bf16.vlgmr.msra.gmra.mrb[32].mxu1 %vm1119_vm1, %v1513_v16 }
 0xab8   : > { %2476 = vmatprep.mubr.msk.bf16.mxu1 %vm3049_vm0, %v3048_v0  ;;  %2461 = vmatpush3.bf16.xpose.msra.mxu1 %v2659_v39  ;;  %p2956_p4 = pneg %p2955_p0 }
 0xab9   : > { %2462 = vmatprep.subr.bf16.mxu1 %v3048_v0 }
 0xaba   : > { %p2963_p2 = pnand %p2962_p10, %p2956_p4 }
 0xac0   : > { %2463 = vmatpush3.bf16.xpose.msra.mxu1 %v2660_v40  ;;  %v2257_v40 = vld [vmem:[%s3849_s14] ss:$0 sm:$0xff] }
 0xac1   : > { %2464 = vmatprep.subr.bf16.mxu1 %v3048_v0 }
 0xac8   : > { %2465 = vmatpush3.bf16.xpose.msra.mxu1 %v2661_v41 }
 0xac9   : > { %2466 = vmatprep.subr.bf16.mxu1 %v3048_v0 }
 0xad0   : > { %2467 = vmatpush3.bf16.xpose.msra.mxu1 %v2662_v9 }
 0xad1   : > { %2468 = vmatprep.subr.bf16.mxu1 %v3048_v0 }
 0xad8   : > { %2469 = vmatpush3.bf16.xpose.msra.mxu1 %v2663_v42 }
 0xad9   : > { %2470 = vmatprep.subr.bf16.mxu1 %v3048_v0 }
 0xae0   : > { %2471 = vmatpush3.bf16.xpose.msra.mxu1 %v2664_v51 }
 0xae1   : > { %2472 = vmatprep.subr.bf16.mxu1 %v3048_v0 }
 0xae8   : > { %2473 = vmatpush3.bf16.xpose.msra.mxu1 %v2665_v52 }
 0xae9   : > { %2474 = vmatprep.subr.bf16.mxu1 %v3048_v0 }
 0xaf0   : > { %2475 = vmatpush3.bf16.xpose.msra.mxu1 %v2666_v53 }
 0xb8a   : > { %v1556_v26 = vpop.f32.mrb[32].mxu1 }
 0xb8b   : > { %1571 = vrot.lane.b32.xlu0 %v1556_v26, %s3055_s12  ;;  %v2438_v27 = vpop.f32.mrb[33].mxu1  ;;  %s3848_s12 = sld [smem:[#allocation42_spill]] }
 0xb8c   : > { %v1559_v28 = vpop.f32.mrb[34].mxu1 }
 0xb8d   : > { %v2439_v29 = vpop.f32.mrb[35].mxu1 }
 0xbfd   : > { %v1572_v36 = vpop.permute.xlu0 %1571 }
 0xbfe   : > { %v1578_v37 = vsel %vm1577_vm4, %v1576_v35, %v1572_v36 }
 0xbff   : > { %v2234_v38 = vpack.c.bf16 %v1578_v37, %v1578_v37 }
 0xc01   : > { %2457 = vmatmul.mubr.msk.bf16.vlgmr.msra.gmra.mrb[8].mxu0 %vm2233_vm6, %v2234_v38  ;;  %v2256_v38 = vld [vmem:[%s3848_s12] ss:$0 sm:$0xff] }
 0xc02   : > { %2496 = vmatprep.mubr.msk.bf16.mxu0 %vm3049_vm0, %v3048_v0  ;;  %2481 = vmatpush3.bf16.xpose.msra.mxu0 %v2667_v54 }
 0xc03   : > { %2482 = vmatprep.subr.bf16.mxu0 %v3048_v0 }
 0xc0a   : > { %2483 = vmatpush3.bf16.xpose.msra.mxu0 %v2668_v55 }
 0xc0b   : > { %2484 = vmatprep.subr.bf16.mxu0 %v3048_v0 }
 0xcd4   : > { %v1687_v44 = vpop.f32.mrb[8].mxu0 }
 0xcd5   : > { %v1688_v45 = vadd.f32 %v2224_v43, %v1687_v44  ;;  %v2458_v46 = vpop.f32.mrb[9].mxu0 }
 0xcd6   : > { %v1690_v47 = vpop.f32.mrb[10].mxu0 }
 0xcd7   : > { %v1693_v48 = vadd.f32 %v1688_v45, %v3540_v18  ;;  %v2459_v49 = vpop.f32.mrb[11].mxu0  ;;  %v2669_v18 = vld [vmem:[#allocation16 + $0x10] sm:$0xff]  }
 0xcd8   : > { %2485 = vmatpush3.bf16.xpose.msra.mxu0 %v2669_v18 }
 0xcd9   : > { %1696 = vadd.xlane.f32.xlu1 %v1693_v48  ;;  %v1698_v50 = vmul.f32 %v1693_v48, %v1693_v48  ;;  %2486 = vmatprep.subr.bf16.mxu0 %v3048_v0 }
 0xcdb   : > { %1699 = vadd.xlane.f32.xlu0 %v1698_v50 }
 0xce0   : > { %2487 = vmatpush3.bf16.xpose.msra.mxu0 %v2670_v56 }
 0xce1   : > { %2488 = vmatprep.subr.bf16.mxu0 %v3048_v0 }
 0xce8   : > { %2489 = vmatpush3.bf16.xpose.msra.mxu0 %v2671_v57 }
 0xce9   : > { %2490 = vmatprep.subr.bf16.mxu0 %v3048_v0 }
 0xcf0   : > { %2491 = vmatpush3.bf16.xpose.msra.mxu0 %v2672_v58 }
 0xcf1   : > { %2492 = vmatprep.subr.bf16.mxu0 %v3048_v0 }
 0xcf8   : > { %2493 = vmatpush3.bf16.xpose.msra.mxu0 %v2673_v59 }
 0xcf9   : > { %2494 = vmatprep.subr.bf16.mxu0 %v3048_v0  ;;  %v2237_v0 = vld [vmem:[%s3844_s17] ss:$0 sm:$0xff]  ;;  %s3850_s17 = sld [smem:[#allocation44_spill]] }
 0xcff   : > { %s3695_s26 = scalar_lea.hbm %s3850_s17, %s2259_s7 }
 0xd00   : > { %2495 = vmatpush3.bf16.xpose.msra.mxu0 %v2674_v30 }
 0xd66   : > { %v1697_v34 = vpop.xlane.xlu1 %1696 }
 0xd67   : > { %v1702_v60 = vmul.f32 0.03125, %v1697_v34 }
 0xd68   : > { %v1700_v61 = vpop.xlane.xlu0 %1699 }
 0xd69   : > { %v1704_v62 = vmul.f32 %v1702_v60, %v1702_v60  ;;  %v1703_v1 = vmul.f32 0.03125, %v1700_v61  ;;  %v1706_v4 = vsub.f32 %v1693_v48, %v1702_v60 }
 0xd6b   : > { %v1705_v2 = vsub.f32 %v1703_v1, %v1704_v62 }
 0xd6d   : > { %v1707_v3 = vadd.f32 1e-05, %v1705_v2 }
 0xd6f   : > { %2691 = vrsqrt.f32 %v1707_v3 }
 0xd79   : > { %v2692_v5 = vpop.eup %2691 }
 0xd7a   : > { %v1709_v7 = vmul.f32 %v2692_v5, %v1706_v4 }
 0xd7c   : > { %v1716_v8 = vmul.f32 %v2236_v6, %v1709_v7 }
 0xd7e   : > { %v1723_v10 = vadd.f32 %v2237_v0, %v1716_v8 }
 0xd80   : > { %v1740_v11 = vpack.c.bf16 %v1723_v10, %v1723_v10 }
 0xd82   : > { %2477 = vmatmul.mubr.bf16.vlgmr.msra.gmra.mrb[36].mxu1 %v1740_v11 }
 0xe55   : > { %v1830_v13 = vpop.f32.mrb[36].mxu1 }
 0xe56   : > { %v1831_v14 = vadd.f32 %v2238_v12, %v1830_v13  ;;  %v2478_v63 = vpop.f32.mrb[37].mxu1 }
 0xe57   : > { %v1833_v15 = vpop.f32.mrb[38].mxu1 }
 0xe58   : > { %v1852_v16 = vpack.c.bf16 %v1831_v14, %v1831_v14  ;;  %v2479_v17 = vpop.f32.mrb[39].mxu1 }
 0xe5a   : > { %2497 = vmatmul.mubr.bf16.vlgmr.msra.gmra.mrb[12].mxu0 %v1852_v16 }
 0xf2d   : > { %v1942_v20 = vpop.f32.mrb[12].mxu0 }
 0xf2e   : > { %v1943_v21 = vadd.f32 %v2247_v19, %v1942_v20  ;;  %v2498_v22 = vpop.f32.mrb[13].mxu0 }
 0xf2f   : > { %v1945_v23 = vpop.f32.mrb[14].mxu0 }
 0xf30   : > { %v1948_v24 = vadd.f32 %v1943_v21, %v1723_v10  ;;  %v2499_v25 = vpop.f32.mrb[15].mxu0 }
 0xf32   : > { %1951 = vadd.xlane.f32.xlu1 %v1948_v24  ;;  %v1953_v26 = vmul.f32 %v1948_v24, %v1948_v24 }
 0xf36   : > { %1954 = vadd.xlane.f32.xlu1 %v1953_v26 }
 0xfbf   : > { %v1952_v27 = vpop.xlane.xlu1 %1951 }
 0xfc0   : > { %v1956_v28 = vmul.f32 0.03125, %v1952_v27 }
 0xfc2   : > { %v1958_v31 = vmul.f32 %v1956_v28, %v1956_v28  ;;  %v1960_v36 = vsub.f32 %v1948_v24, %v1956_v28 }
 0xfc3   : > { %v1955_v29 = vpop.xlane.xlu1 %1954 }
 0xfc4   : > { %v1957_v32 = vmul.f32 0.03125, %v1955_v29 }
 0xfc6   : > { %v1959_v33 = vsub.f32 %v1957_v32, %v1958_v31 }
 0xfc8   : > { %v1961_v35 = vadd.f32 1e-05, %v1959_v33 }
 0xfca   : > { %2693 = vrsqrt.f32 %v1961_v35 }
 0xfd4   : > { %v2694_v37 = vpop.eup %2693 }
 0xfd5   : > { %v1963_v39 = vmul.f32 %v2694_v37, %v1960_v36 }
 0xfd7   : > { %v1970_v41 = vmul.f32 %v2256_v38, %v1963_v39 }
 0xfd9   : > { %v1977_v9 = vadd.f32 %v2257_v40, %v1970_v41 }
 0xfdb   : > { %1978 = vst [vmem:[%s775_s23] sm:$0xff] %v1977_v9 }
 0xfdc   : > { %2966 = shalt.err (!%p2963_p2)
}
 0xfdd   : > { %s2967_s28 = scalar_lea.hbm %s3695_s26, 128  ;;  %s2971_s25 = scalar_lea.hbm %s3850_s17, 256 }
 0xfde   : > { %p2968_p8 = scmp.ne.s32.totalorder %s3695_s26, %s2967_s28  ;;  %p2972_p9 = scmp.lt.u32.totalorder %s3695_s26, %s3850_s17 }
 0xfdf   : > { %p2973_p11 = scmp.lt.u32.totalorder %s2971_s25, %s2967_s28  ;;  %p2975_p6 = scmp.lt.u32.totalorder %s2967_s28, %s3695_s26 }
 0xfe0   : > { %p2969_p13 = pnand %p2968_p8, %p3851_p1 }
 0xfe1   : > { %p2974_p3 = por %p2973_p11, %p2972_p9 }
 0xfe2   : > { %p2970_p5 = pneg %p2969_p13 }
 0xfe3   : > { %p2976_p0 = por %p2975_p6, %p2974_p3 }
 0xfe5   : > { %p2977_p4 = pnand %p2976_p0, %p2970_p5 }
 0xfe7   : > { %2980 = shalt.err (!%p2977_p4)
}
 0xfe8   : > { %2530 = dma.vmem_to_hbm [thread:$0]  (%p3851_p1), %s3697_s10, 128, %s3695_s26, %s1980_s0  }
 0xfe9 PF: > { %s3852_s24 = sld [smem:[#allocation24_spill]]  ;;  %s3853_s3 = sld [smem:[#allocation29_spill]] }
 0xfea   : > { %s3854_s14 = sld [smem:[#allocation25_spill]] }
 0xfef   : > { %s2005_s7 = sand.u32 1, %s3852_s24   ;;  %p3855_p7 = scmp.ne.s32.totalorder %s3853_s3, 0 }
 0xff0   : > { %p3856_p12 = scmp.ge.s32.totalorder %s3854_s14, 2  ;;  %s2006_s23 = scalar_lea.sflag [#allocation4], %s2005_s7 }
 0xff2   : > { %p2562_p10 = pnand %p3856_p12, %p3855_p7 }
 0xff4   : > { %3018 = dma.done.wait (!%p2562_p10), %s2006_s23, 128  }
 0xff5   : > { %3020 = vsyncadd (!%p2562_p10), %s2006_s23, 4294967168  ;;  %s3857_s21 = sld [smem:[#allocation26_spill]]  ;;  %s3858_s16 = sld [smem:[#allocation27_spill]] }
 0xff6   : > { %s3859_s0 = smov %s3027_s30  ;;  %s3860_s30 = smov %s3031_s20 }
 0xffb   : > { %p38_p2 = scmp.ge.s32.totalorder %s3857_s21, 4   ;;  %s3861_s20 = smov %s3858_s16 }
 0xffd   :  { %40 = sbr.rel (!%p38_p2) target bundleno = 26 (0x1a), region = 189 }
0x1004   :  { %2011 = vsyncpa [#allocation3], 1 }
0x1005   :  { %2013 = vsyncpa [#allocation3 + $0x1], 1 }
0x1006   :  { %2014 = vsyncpa [#allocation6], 1 }
0x1007   :  { %2016 = vsyncpa [#allocation6 + $0x1], 1 }
0x1008   :  { %2017 = vsyncpa [#allocation9], 1 }
0x1009   :  { %2018 = vsyncpa [#allocation12], 1 }
0x100a   :  { %2019 = vsyncpa [#allocation15], 1 }
0x100b   :  { %2020 = vsyncpa [#allocation4], 1 }
0x100c   :  { %2022 = vsyncpa [#allocation4 + $0x1], 1 }

</bundles_post_ra>
